<compile_context>
chip_gen: v6e
topology: v6e:2x2x1
jax: 0.10.0
libtpu: 0.0.40
codegen_flags: <defaults>
</compile_context>

<pallas_src>
import jax
import jax.numpy as jnp
from jax.experimental import pallas as pl
from jax.experimental.pallas import tpu as pltpu


def _round_up(n, m):
    return ((n + m - 1) // m) * m


def _num_tensorcores():
    """TensorCores a single pallas_call's 'parallel' axis can shard across."""
    try:
        n = getattr(pltpu.get_tpu_info(), "num_cores", None)
        if n:
            return int(n)
    except Exception:
        pass
    return int(getattr(jax.devices()[0], "num_cores", 1) or 1)


def _vmem_limit_bytes():
    """~0.9x physical VMEM; 64 MiB fallback is safe on every generation."""
    cap = 64 << 20
    try:
        cap = int(getattr(pltpu.get_tpu_info(), "vmem_capacity_bytes", cap)) or cap
    except Exception:
        pass
    return int(0.9 * cap)


def _choose_tb(batch, tb_request, num_cores):
    """Batch tile: multiple of 128 (lane-dense output stores) when the batch
    allows it, capped by the batch and by the per-TensorCore share so the
    'parallel' grid axis keeps every core busy."""
    tb = max(128, _round_up(int(tb_request), 128))
    tb = min(tb, _round_up(max(batch, 1), 8))          # 8-row f32 sublane packing
    if num_cores > 1 and batch > 8 * num_cores:
        per_core = -(-batch // num_cores)              # cdiv
        cap = _round_up(per_core, 128) if per_core >= 128 else _round_up(per_core, 8)
        tb = min(tb, cap)
    return max(8, tb)


def _choose_tk(d_in, cap=4096):
    """Layer-1 K tile: a multiple of 128 that divides D_in exactly (no partial
    K tiles -> no garbage entering the reduction)."""
    if d_in <= cap:
        return d_in
    for t in range(cap, 127, -128):
        if d_in % t == 0:
            return t
    return d_in   # unreachable for D_in = channels * 1024


def _discriminator_kernel(x_ref, w1_ref, b1_ref, w2_ref, b2_ref, w3_ref, b3_ref,
                          o_ref, acc_ref):
    """Grid = (batch tiles, layer-1 K tiles); the K axis accumulates x @ w1.

    x_ref : (tb, tk)   f32 slab of the input (cast to the MXU dtype in-kernel)
    w1_ref: (tk, 512)  compute dtype      b1_ref: (1, 512) f32
    w2_ref: (512, 256) compute dtype      b2_ref: (1, 256) f32
    w3_ref: (1, 256)   f32  (final N=1 layer runs on the VPU/XLU, not the MXU)
    b3_ref: (1, 1)     f32 scalar in SMEM
    o_ref : (1, 1, tb) f32 lane-dense output row (batch on lanes)
    acc_ref:(tb, 512)  f32 VMEM scratch accumulating layer 1
    """
    k = pl.program_id(1)

    @pl.when(k == 0)
    def _():
        acc_ref[...] = jnp.zeros_like(acc_ref)

    # Layer-1 partial product: cast the f32 x slab on the VPU, accumulate f32.
    xk = x_ref[...].astype(w1_ref.dtype)
    acc_ref[...] += jnp.dot(xk, w1_ref[...], preferred_element_type=jnp.float32)

    @pl.when(k == pl.num_programs(1) - 1)
    def _():
        h1 = acc_ref[...] + b1_ref[...]
        h1 = jnp.where(h1 > 0, h1, 0.2 * h1)                       # LeakyReLU(0.2)

        h2 = jnp.dot(h1.astype(w2_ref.dtype), w2_ref[...],
                     preferred_element_type=jnp.float32) + b2_ref[...]
        h2 = jnp.where(h2 > 0, h2, 0.2 * h2)                       # (tb, 256) f32

        # Layer 3 (out_features == 1): VPU multiply + cross-lane reduction
        # instead of a wasted N=1 MXU pass.
        logit = jnp.sum(h2 * w3_ref[...], axis=-1) + b3_ref[0, 0]  # (tb,)

        # Exact sigmoid: exp on the EUP; the f32 divide is negligible here.
        sig = 1.0 / (1.0 + jnp.exp(-logit))
        o_ref[...] = sig.reshape(o_ref.shape)


def discriminator_forward(x, params, *, tb=512, compute_dtype=jnp.bfloat16):
    """x: [B, channels*1024] float32; params hold (in,out) weights / (1,out)
    biases.  Returns [B, 1] float32 sigmoid outputs, matching the PyTorch
    module.  compute_dtype=jnp.float32 is the full-precision escape hatch."""
    w1, b1, w2, b2, w3, b3 = (params["w1"], params["b1"], params["w2"],
                              params["b2"], params["w3"], params["b3"])
    B, D_in = x.shape
    H1, H2 = w1.shape[1], w2.shape[1]
    assert D_in % 128 == 0, "feature dim (channels*1024) must be lane-aligned"

    num_cores = _num_tensorcores()
    tb_eff = _choose_tb(B, tb, num_cores)
    tk = _choose_tk(D_in)
    grid = (pl.cdiv(B, tb_eff), D_in // tk)      # K tiles divide D_in exactly

    csize = jnp.dtype(compute_dtype).itemsize
    # Weights are cast once in the wrapper (tiny, and they may be re-streamed
    # per batch tile when D_in is K-tiled); x stays f32 and is cast in-kernel.
    w1c = w1.astype(compute_dtype)
    w2c = w2.astype(compute_dtype)
    b1f = b1.reshape(1, H1).astype(jnp.float32)
    b2f = b2.reshape(1, H2).astype(jnp.float32)
    w3_row = w3.reshape(H2, 1).T.astype(jnp.float32)    # (1, H2), used on the VPU
    b3_s = b3.reshape(1, 1).astype(jnp.float32)         # scalar -> SMEM

    # Constant index_map => block stays resident, never re-DMA'd.
    resident = lambda shape: pl.BlockSpec(shape, lambda i, k: (0, 0))

    cost = pl.CostEstimate(
        flops=2 * B * (D_in * H1 + H1 * H2 + H2),
        transcendentals=B,
        bytes_accessed=int(B * D_in * 4 + (D_in * H1 + H1 * H2) * csize
                           + (H1 + 2 * H2 + 1) * 4 + B * 4),
    )

    out = pl.pallas_call(
        _discriminator_kernel,
        out_shape=jax.ShapeDtypeStruct((grid[0], 1, tb_eff), jnp.float32),
        grid_spec=pltpu.PrefetchScalarGridSpec(
            num_scalar_prefetch=0,
            grid=grid,
            in_specs=[
                pl.BlockSpec((tb_eff, tk), lambda i, k: (i, k)),    # x slab (f32)
                pl.BlockSpec((tk, H1), lambda i, k: (k, 0)),        # w1 K tile
                resident((1, H1)),                                  # b1
                resident((H1, H2)),                                 # w2
                resident((1, H2)),                                  # b2
                resident((1, H2)),                                  # w3 row (VPU)
                pl.BlockSpec(memory_space=pltpu.MemorySpace.SMEM),  # b3 scalar
            ],
            out_specs=pl.BlockSpec((1, 1, tb_eff), lambda i, k: (i, 0, 0)),
            scratch_shapes=[pltpu.VMEM((tb_eff, H1), jnp.float32)],
        ),
        compiler_params=pltpu.CompilerParams(
            dimension_semantics=("parallel", "arbitrary"),
            vmem_limit_bytes=_vmem_limit_bytes(),
        ),
        cost_estimate=cost,
    )(x.astype(jnp.float32), w1c, b1f, w2c, b2f, w3_row, b3_s)

    # Lane-dense (num_tiles, 1, tb) rows -> (B, 1).  Rows past B (partial last
    # batch tile) carried garbage values and are dropped here.
    return out.reshape(grid[0] * tb_eff, 1)[:B]


def init_params(key, channels):
    """Deterministic synthetic parameters (shapes match the nn.Linear layers)."""
    d_in = channels * 1024
    ks = jax.random.split(key, 6)

    def lin(kw, kb, fan_in, fan_out):
        bound = 1.0 / jnp.sqrt(fan_in)
        w = jax.random.uniform(kw, (fan_in, fan_out), jnp.float32, -bound, bound)
        b = jax.random.uniform(kb, (1, fan_out), jnp.float32, -bound, bound)
        return w, b

    w1, b1 = lin(ks[0], ks[1], d_in, 512)
    w2, b2 = lin(ks[2], ks[3], 512, 256)
    w3, b3 = lin(ks[4], ks[5], 256, 1)
    return {"w1": w1, "b1": b1, "w2": w2, "b2": b2, "w3": w3, "b3": b3}


def _reference_forward(x, p):
    h1 = x @ p["w1"] + p["b1"]
    h1 = jnp.where(h1 > 0, h1, 0.2 * h1)
    h2 = h1 @ p["w2"] + p["b2"]
    h2 = jnp.where(h2 > 0, h2, 0.2 * h2)
    return jax.nn.sigmoid(h2 @ p["w3"] + p["b3"])


if __name__ == "__main__":
    channels = 1          # input features = channels * 1024 = 1024
    batch = 20            # not a tile multiple: exercises the masked partial tile
    key = jax.random.PRNGKey(0)
    kx, kp = jax.random.split(key)

    x = jax.random.normal(kx, (batch, channels * 1024), jnp.float32)
    params = init_params(kp, channels)

    out = jax.block_until_ready(discriminator_forward(x, params))
    ref = _reference_forward(x, params)

    assert out.shape == (batch, 1)
    assert bool(jnp.all(jnp.isfinite(out)))
    # bf16 MXU operands with f32 accumulation => relaxed tolerance vs f32 ref.
    assert jnp.allclose(out, ref, atol=2e-2, rtol=2e-2), \
        float(jnp.max(jnp.abs(out - ref)))

    print("KERNEL_OK")
</pallas_src>

<mosaic_0001>
module attributes {stable_mosaic.version = 11 : i64} {
  func.func @_discriminator_kernel(%arg0: i32, %arg1: i32, %arg2: memref<24x1024xf32, #tpu.memory_space<vmem>>, %arg3: memref<1024x512xbf16, #tpu.memory_space<vmem>>, %arg4: memref<1x512xf32, #tpu.memory_space<vmem>>, %arg5: memref<512x256xbf16, #tpu.memory_space<vmem>>, %arg6: memref<1x256xf32, #tpu.memory_space<vmem>>, %arg7: memref<1x256xf32, #tpu.memory_space<vmem>>, %arg8: memref<1x1xf32, #tpu.memory_space<smem>>, %arg9: memref<1x1x24xf32, #tpu.memory_space<vmem>>, %arg10: memref<24x512xf32, #tpu.memory_space<vmem>>) attributes {dimension_semantics = [#tpu.dimension_semantics<parallel>, #tpu.dimension_semantics<arbitrary>], iteration_bounds = array<i64: 1, 1>, scalar_prefetch = 0 : i64, scratch_operands = 1 : i64, tpu.core_type = #tpu.core_type<tc>, window_params = [{transform_indices = @transform_0, window_bounds = array<i64: 24, 1024>}, {transform_indices = @transform_1, window_bounds = array<i64: 1024, 512>}, {pipeline_mode = #tpu.pipeline_mode<synchronous>, transform_indices = @transform_2, window_bounds = array<i64: 1, 512>}, {pipeline_mode = #tpu.pipeline_mode<synchronous>, transform_indices = @transform_3, window_bounds = array<i64: 512, 256>}, {pipeline_mode = #tpu.pipeline_mode<synchronous>, transform_indices = @transform_4, window_bounds = array<i64: 1, 256>}, {pipeline_mode = #tpu.pipeline_mode<synchronous>, transform_indices = @transform_5, window_bounds = array<i64: 1, 256>}, {transform_indices = @transform_6, window_bounds = array<i64: 1, 1>}, {transform_indices = @transform_7, window_bounds = array<i64: 1, 1, 24>}]} {
    %c0_i32 = arith.constant 0 : i32
    %0 = arith.cmpi eq, %arg1, %c0_i32 : i32
    %1 = arith.extui %0 : i1 to i32
    %c0_i32_0 = arith.constant 0 : i32
    %2 = arith.cmpi ne, %1, %c0_i32_0 : i32
    scf.if %2 {
      %cst_10 = arith.constant 0.000000e+00 : f32
      %13 = vector.broadcast %cst_10 : f32 to vector<24x512xf32>
      %c0_11 = arith.constant 0 : index
      %c0_12 = arith.constant 0 : index
      %14 = vector.load %arg10[%c0_11, %c0_12] : memref<24x512xf32, #tpu.memory_space<vmem>>, vector<24x512xf32>
      tpu.vector_store %arg10[%c0_11, %c0_12], %13 {strides = array<i32>} : memref<24x512xf32, #tpu.memory_space<vmem>>, vector<24x512xf32>,
    } else {
    }
    %c0 = arith.constant 0 : index
    %c0_1 = arith.constant 0 : index
    %3 = vector.load %arg2[%c0, %c0_1] : memref<24x1024xf32, #tpu.memory_space<vmem>>, vector<24x1024xf32>
    %4 = arith.truncf %3 : vector<24x1024xf32> to vector<24x1024xbf16>
    %c0_2 = arith.constant 0 : index
    %c0_3 = arith.constant 0 : index
    %5 = vector.load %arg10[%c0_2, %c0_3] : memref<24x512xf32, #tpu.memory_space<vmem>>, vector<24x512xf32>
    %c0_4 = arith.constant 0 : index
    %c0_5 = arith.constant 0 : index
    %6 = vector.load %arg3[%c0_4, %c0_5] : memref<1024x512xbf16, #tpu.memory_space<vmem>>, vector<1024x512xbf16>
    %cst = arith.constant dense<0.000000e+00> : vector<24x512xf32>
    %7 = tpu.matmul %4, %6, %cst {dimension_numbers = #tpu.dot_dimension_numbers<[1], [0], [0], [1], [0, 0, 1, 1], [], []>} : vector<24x1024xbf16>, vector<1024x512xbf16>, vector<24x512xf32> -> vector<24x512xf32>
    %8 = arith.addf %5, %7 : vector<24x512xf32>
    %c0_6 = arith.constant 0 : index
    %c0_7 = arith.constant 0 : index
    %9 = vector.load %arg10[%c0_6, %c0_7] : memref<24x512xf32, #tpu.memory_space<vmem>>, vector<24x512xf32>
    tpu.vector_store %arg10[%c0_6, %c0_7], %8 {strides = array<i32>} : memref<24x512xf32, #tpu.memory_space<vmem>>, vector<24x512xf32>,
    %c0_i32_8 = arith.constant 0 : i32
    %10 = arith.cmpi eq, %arg1, %c0_i32_8 : i32
    %11 = arith.extui %10 : i1 to i32
    %c0_i32_9 = arith.constant 0 : i32
    %12 = arith.cmpi ne, %11, %c0_i32_9 : i32
    scf.if %12 {
      %c0_10 = arith.constant 0 : index
      %c0_11 = arith.constant 0 : index
      %13 = vector.load %arg10[%c0_10, %c0_11] : memref<24x512xf32, #tpu.memory_space<vmem>>, vector<24x512xf32>
      %c0_12 = arith.constant 0 : index
      %c0_13 = arith.constant 0 : index
      %14 = vector.load %arg4[%c0_12, %c0_13] : memref<1x512xf32, #tpu.memory_space<vmem>>, vector<1x512xf32>
      %15 = vector.broadcast %14 : vector<1x512xf32> to vector<24x512xf32>
      %16 = arith.addf %13, %15 : vector<24x512xf32>
      %cst_14 = arith.constant 0.000000e+00 : f32
      %17 = vector.broadcast %cst_14 : f32 to vector<24x512xf32>
      %18 = arith.cmpf ogt, %16, %17 : vector<24x512xf32>
      %cst_15 = arith.constant 2.000000e-01 : f32
      %19 = vector.broadcast %cst_15 : f32 to vector<24x512xf32>
      %20 = arith.mulf %19, %16 : vector<24x512xf32>
      %21 = arith.select %18, %16, %20 : vector<24x512xi1>, vector<24x512xf32>
      %22 = arith.truncf %21 : vector<24x512xf32> to vector<24x512xbf16>
      %c0_16 = arith.constant 0 : index
      %c0_17 = arith.constant 0 : index
      %23 = vector.load %arg5[%c0_16, %c0_17] : memref<512x256xbf16, #tpu.memory_space<vmem>>, vector<512x256xbf16>
      %cst_18 = arith.constant dense<0.000000e+00> : vector<24x256xf32>
      %24 = tpu.matmul %22, %23, %cst_18 {dimension_numbers = #tpu.dot_dimension_numbers<[1], [0], [0], [1], [0, 0, 1, 1], [], []>} : vector<24x512xbf16>, vector<512x256xbf16>, vector<24x256xf32> -> vector<24x256xf32>
      %c0_19 = arith.constant 0 : index
      %c0_20 = arith.constant 0 : index
      %25 = vector.load %arg6[%c0_19, %c0_20] : memref<1x256xf32, #tpu.memory_space<vmem>>, vector<1x256xf32>
      %26 = vector.broadcast %25 : vector<1x256xf32> to vector<24x256xf32>
      %27 = arith.addf %24, %26 : vector<24x256xf32>
      %cst_21 = arith.constant 0.000000e+00 : f32
      %28 = vector.broadcast %cst_21 : f32 to vector<24x256xf32>
      %29 = arith.cmpf ogt, %27, %28 : vector<24x256xf32>
      %cst_22 = arith.constant 2.000000e-01 : f32
      %30 = vector.broadcast %cst_22 : f32 to vector<24x256xf32>
      %31 = arith.mulf %30, %27 : vector<24x256xf32>
      %32 = arith.select %29, %27, %31 : vector<24x256xi1>, vector<24x256xf32>
      %c0_23 = arith.constant 0 : index
      %c0_24 = arith.constant 0 : index
      %33 = vector.load %arg7[%c0_23, %c0_24] : memref<1x256xf32, #tpu.memory_space<vmem>>, vector<1x256xf32>
      %34 = vector.broadcast %33 : vector<1x256xf32> to vector<24x256xf32>
      %35 = arith.mulf %32, %34 : vector<24x256xf32>
      %cst_25 = arith.constant dense<0.000000e+00> : vector<24xf32>
      %36 = vector.multi_reduction <add>, %35, %cst_25 [1] : vector<24x256xf32> to vector<24xf32>
      %c0_26 = arith.constant 0 : index
      %c0_27 = arith.constant 0 : index
      %37 = memref.load %arg8[%c0_26, %c0_27] : memref<1x1xf32, #tpu.memory_space<smem>>
      %38 = vector.broadcast %37 : f32 to vector<24xf32>
      %39 = arith.addf %36, %38 : vector<24xf32>
      %cst_28 = arith.constant 0.000000e+00 : f32
      %40 = vector.broadcast %cst_28 : f32 to vector<24xf32>
      %41 = arith.subf %40, %39 : vector<24xf32>
      %42 = math.exp %41 : vector<24xf32>
      %cst_29 = arith.constant 1.000000e+00 : f32
      %43 = vector.broadcast %cst_29 : f32 to vector<24xf32>
      %44 = arith.addf %43, %42 : vector<24xf32>
      %cst_30 = arith.constant 1.000000e+00 : f32
      %45 = vector.broadcast %cst_30 : f32 to vector<24xf32>
      %46 = arith.divf %45, %44 : vector<24xf32>
      %47 = vector.shape_cast %46 : vector<24xf32> to vector<1x1x24xf32>
      %c0_31 = arith.constant 0 : index
      %c0_32 = arith.constant 0 : index
      %c0_33 = arith.constant 0 : index
      %48 = vector.load %arg9[%c0_31, %c0_32, %c0_33] : memref<1x1x24xf32, #tpu.memory_space<vmem>>, vector<1x1x24xf32>
      tpu.vector_store %arg9[%c0_31, %c0_32, %c0_33], %47 {strides = array<i32>} : memref<1x1x24xf32, #tpu.memory_space<vmem>>, vector<1x1x24xf32>,
    } else {
    }
    return
  }
  func.func @transform_0(%arg0: i32, %arg1: i32) -> (i32, i32) {
    %c0_i32 = arith.constant 0 : i32
    return %arg0, %arg1 : i32, i32
  }
  func.func @transform_1(%arg0: i32, %arg1: i32) -> (i32, i32) {
    %c0_i32 = arith.constant 0 : i32
    %c0_i32_0 = arith.constant 0 : i32
    return %arg1, %c0_i32 : i32, i32
  }
  func.func @transform_2(%arg0: i32, %arg1: i32) -> (i32, i32) {
    %c0_i32 = arith.constant 0 : i32
    %c0_i32_0 = arith.constant 0 : i32
    %c0_i32_1 = arith.constant 0 : i32
    return %c0_i32, %c0_i32_0 : i32, i32
  }
  func.func @transform_3(%arg0: i32, %arg1: i32) -> (i32, i32) {
    %c0_i32 = arith.constant 0 : i32
    %c0_i32_0 = arith.constant 0 : i32
    %c0_i32_1 = arith.constant 0 : i32
    return %c0_i32, %c0_i32_0 : i32, i32
  }
  func.func @transform_4(%arg0: i32, %arg1: i32) -> (i32, i32) {
    %c0_i32 = arith.constant 0 : i32
    %c0_i32_0 = arith.constant 0 : i32
    %c0_i32_1 = arith.constant 0 : i32
    return %c0_i32, %c0_i32_0 : i32, i32
  }
  func.func @transform_5(%arg0: i32, %arg1: i32) -> (i32, i32) {
    %c0_i32 = arith.constant 0 : i32
    %c0_i32_0 = arith.constant 0 : i32
    %c0_i32_1 = arith.constant 0 : i32
    return %c0_i32, %c0_i32_0 : i32, i32
  }
  func.func @transform_6(%arg0: i32, %arg1: i32) -> (i32, i32) {
    %c0_i32 = arith.constant 0 : i32
    %c0_i32_0 = arith.constant 0 : i32
    %c0_i32_1 = arith.constant 0 : i32
    return %c0_i32, %c0_i32_0 : i32, i32
  }
  func.func @transform_7(%arg0: i32, %arg1: i32) -> (i32, i32, i32) {
    %c0_i32 = arith.constant 0 : i32
    %c0_i32_0 = arith.constant 0 : i32
    %c0_i32_1 = arith.constant 0 : i32
    return %arg0, %c0_i32, %c0_i32_0 : i32, i32, i32
  }
}

</mosaic_0001>

<bundles_post_ra>
// kernel: tpu_custom_call.1
= control target key start
LH: loop header
LB: loop body
LE: loop exit
PB: predicated region body
PF: predicated region fallthrough
CT: control target
= control target key end

     0   :  { %13 = vsyncpa [#allocation5], 0  ;;  %s3916_s0 = inlined_call_operand.hbm [shape: f32[20,1024], index: 0, kind: input, shape index: {}]   ;;  %s3917_s1 = inlined_call_operand.hbm [shape: bf16[1024,512], index: 1, kind: input, shape index: {}]   ;;  %s3918_s2 = inlined_call_operand.vmem [shape: f32[1,512], index: 2, kind: input, shape index: {}]   ;;  %s3919_s3 = inlined_call_operand.hbm [shape: bf16[512,256], index: 3, kind: input, shape index: {}]   ;;  %s3920_s4 = inlined_call_operand.vmem [shape: f32[1,256], index: 4, kind: input, shape index: {}]   ;;  %s3921_s5 = inlined_call_operand.vmem [shape: f32[1,256], index: 5, kind: input, shape index: {}]   ;;  %s3922_s6 = inlined_call_operand.<no memory space> [shape: f32[1,1], index: 6, kind: input, shape index: {}]   ;;  %s3923_s7 = inlined_call_operand.hbm [shape: f32[1,1,24], index: 7, kind: output, shape index: {}]  }
   0x1   :  { %14 = vsyncpa [#allocation8], 0 }
   0x2   :  { %15 = vsyncpa [#allocation6], 0  ;;  %s3714_s24 = smov [#allocation7]  }
   0x3   :  { %s33_s25 = sshll.u32 %s3714_s24, 4  ;;  %s34_s25 = int_to_ptr.vmem [resolvable:$true] %s33_s25 }
   0x4   :  { %s3636_s26 = scalar_lea.vmem %s34_s25, 32768  ;;  %p3641_p1 = scmp.lt.s32.totalorder %s34_s25, %s34_s25 }
   0x5   :  { %p3637_p0 = scmp.ne.s32.totalorder %s34_s25, %s3636_s26  ;;  %p3642_p2 = scmp.lt.s32.totalorder %s3636_s26, %s3636_s26 }
   0x7   :  { %p3643_p3 = por %p3642_p2, %p3641_p1 }
   0x9   :  { %p3644_p4 = pnand %p3643_p3, %p3637_p0 }
   0xb   :  { %3647 = shalt.err (!%p3644_p4)
}
   0xc   :  { %s3715_s27 = smov 256   ;;  %s3716_s28 = smov 16  }
   0xd   :  { %39 = dma.hbm_to_vmem [thread:$0]  %s3917_s1, 32768, %s34_s25, [#allocation8], %s3715_s27, %s3715_s27, %s3716_s28  }
   0xe   :  { %s3717_s8 = smov [#allocation4]  }
   0xf   :  { %s21_s9 = sshll.u32 %s3717_s8, 4  ;;  %s22_s9 = int_to_ptr.vmem [resolvable:$true] %s21_s9 }
  0x10   :  { %s3656_s10 = scalar_lea.vmem %s22_s9, 3072  ;;  %p3661_p6 = scmp.lt.s32.totalorder %s22_s9, %s22_s9 }
  0x11   :  { %p3657_p5 = scmp.ne.s32.totalorder %s22_s9, %s3656_s10  ;;  %p3662_p7 = scmp.lt.s32.totalorder %s3656_s10, %s3656_s10 }
  0x13   :  { %p3663_p8 = por %p3662_p7, %p3661_p6 }
  0x15   :  { %p3664_p9 = pnand %p3663_p8, %p3657_p5 }
  0x17   :  { %3667 = shalt.err (!%p3664_p9)
}
  0x18   :  { %s3718_s11 = smov 1024   ;;  %s3719_s12 = smov 64  }
  0x19   :  { %27 = dma.hbm_to_vmem [thread:$0]  %s3916_s0, 3072, %s22_s9, [#allocation5], %s3718_s11, %s3718_s11, %s3719_s12  }
  0x1a   :  { %s3720_s15 = smov [#allocation9]  }
  0x1b   :  { %s47_s16 = sshll.u32 %s3720_s15, 4  ;;  %s48_s16 = int_to_ptr.vmem [resolvable:$true] %s47_s16 }
  0x1c   :  { %s3676_s1 = scalar_lea.vmem %s48_s16, 8192  ;;  %p3681_p11 = scmp.lt.s32.totalorder %s48_s16, %s48_s16 }
  0x1d   :  { %p3677_p10 = scmp.ne.s32.totalorder %s48_s16, %s3676_s1  ;;  %p3682_p12 = scmp.lt.s32.totalorder %s3676_s1, %s3676_s1 }
  0x1f   :  { %p3683_p13 = por %p3682_p12, %p3681_p11 }
  0x21   :  { %p3684_p0 = pnand %p3683_p13, %p3677_p10 }
  0x23   :  { %3687 = shalt.err (!%p3684_p0)
}
  0x24   :  { %s3721_s17 = smov 128   ;;  %s3722_s18 = smov 8  }
  0x25   :  { %53 = dma.hbm_to_vmem [thread:$0]  %s3919_s3, 8192, %s48_s16, [#allocation8], %s3721_s17, %s3721_s17, %s3722_s18  }
  0x26   :  { %3708 = dma.done.wait [#allocation5], 3072  }
  0x27   :  { %3709 = vsyncadd [#allocation5], 4294964224 }
  0x28   :  { %3710 = dma.done.wait [#allocation8], 40960  }
  0x29   :  { %3711 = vsyncadd [#allocation8], 4294926336  ;;  %v3136_v0 = vld [vmem:[#allocation7 + $0xe4] ss:$16 sps:$4 sm:$0xff]   ;;  %v3140_v2 = vld [vmem:[#allocation7 + $0xe0] ss:$16 sps:$4 sm:$0xff]  }
  0x2a   :  { %v3138_v1 = vld [vmem:[#allocation7 + $0x2e4] ss:$16 sps:$4 sm:$0xff]   ;;  %1673 = vmatprep.subr.bf16.mxu0 %v3136_v0  ;;  %v3141_v3 = vld [vmem:[#allocation7 + $0x2e0] ss:$16 sps:$4 sm:$0xff]   ;;  %v86_v46 = vld [vmem:[#allocation4 + $0x8] sm:$0xff] }
  0x2b   :  { %1724 = vmatprep.subr.bf16.mxu1 %v3138_v1  ;;  %v3142_v4 = vld [vmem:[#allocation7 + $0xc4] ss:$16 sps:$4 sm:$0xff]   ;;  %1674 = vmatpush1.bf16.msra.mxu0 %v3140_v2  ;;  %v3146_v6 = vld [vmem:[#allocation7 + $0xc0] ss:$16 sps:$4 sm:$0xff]   ;;  %v94_v47 = vld [vmem:[#allocation4 + $0x48] sm:$0xff] }
  0x2c   :  { %1725 = vmatpush1.bf16.msra.mxu1 %v3141_v3  ;;  %v3144_v5 = vld [vmem:[#allocation7 + $0x2c4] ss:$16 sps:$4 sm:$0xff]   ;;  %1675 = vmatprep.subr.bf16.mxu0 %v3142_v4  ;;  %v3147_v7 = vld [vmem:[#allocation7 + $0x2c0] ss:$16 sps:$4 sm:$0xff]   ;;  %v88_v48 = vld [vmem:[#allocation4 + $0x18] sm:$0xff]  ;;  %v3773_v53 = vpack.c.bf16 %v94_v47, %v86_v46 }
  0x2d   :  { %1726 = vmatprep.subr.bf16.mxu1 %v3144_v5  ;;  %v3148_v8 = vld [vmem:[#allocation7 + $0xa4] ss:$16 sps:$4 sm:$0xff]   ;;  %v3152_v10 = vld [vmem:[#allocation7 + $0xa0] ss:$16 sps:$4 sm:$0xff]   ;;  %v96_v49 = vld [vmem:[#allocation4 + $0x58] sm:$0xff] }
  0x2e   :  { %v3150_v9 = vld [vmem:[#allocation7 + $0x2a4] ss:$16 sps:$4 sm:$0xff]   ;;  %v3153_v11 = vld [vmem:[#allocation7 + $0x2a0] ss:$16 sps:$4 sm:$0xff]   ;;  %v3775_v54 = vpack.c.bf16 %v96_v49, %v88_v48  ;;  %1705 = vmatprep.mubr.bf16.mxu0 %v3773_v53 }
  0x2f   :  { %1676 = vmatpush1.bf16.msra.mxu0 %v3146_v6  ;;  %v3154_v12 = vld [vmem:[#allocation7 + $0x84] ss:$16 sps:$4 sm:$0xff]   ;;  %v3158_v14 = vld [vmem:[#allocation7 + $0x80] ss:$16 sps:$4 sm:$0xff]  }
  0x30   :  { %1727 = vmatpush1.bf16.msra.mxu1 %v3147_v7  ;;  %1677 = vmatprep.subr.bf16.mxu0 %v3148_v8  ;;  %v3156_v13 = vld [vmem:[#allocation7 + $0x284] ss:$16 sps:$4 sm:$0xff]   ;;  %v3159_v15 = vld [vmem:[#allocation7 + $0x280] ss:$16 sps:$4 sm:$0xff]  }
  0x31   :  { %1728 = vmatprep.subr.bf16.mxu1 %v3150_v9  ;;  %v3160_v16 = vld [vmem:[#allocation7 + $0x64] ss:$16 sps:$4 sm:$0xff]   ;;  %v3164_v18 = vld [vmem:[#allocation7 + $0x60] ss:$16 sps:$4 sm:$0xff]   ;;  %1756 = vmatprep.mubr.bf16.mxu1 %v3775_v54 }
  0x32   :  { %v3162_v17 = vld [vmem:[#allocation7 + $0x264] ss:$16 sps:$4 sm:$0xff]   ;;  %v3165_v19 = vld [vmem:[#allocation7 + $0x260] ss:$16 sps:$4 sm:$0xff]  }
  0x33   :  { %1678 = vmatpush1.bf16.msra.mxu0 %v3152_v10  ;;  %v3166_v20 = vld [vmem:[#allocation7 + $0x44] ss:$16 sps:$4 sm:$0xff]   ;;  %v3170_v22 = vld [vmem:[#allocation7 + $0x40] ss:$16 sps:$4 sm:$0xff]  }
  0x34   :  { %1729 = vmatpush1.bf16.msra.mxu1 %v3153_v11  ;;  %1679 = vmatprep.subr.bf16.mxu0 %v3154_v12  ;;  %v3168_v21 = vld [vmem:[#allocation7 + $0x244] ss:$16 sps:$4 sm:$0xff]   ;;  %v3171_v23 = vld [vmem:[#allocation7 + $0x240] ss:$16 sps:$4 sm:$0xff]  }
  0x35   :  { %1730 = vmatprep.subr.bf16.mxu1 %v3156_v13  ;;  %v3172_v24 = vld [vmem:[#allocation7 + $0x24] ss:$16 sps:$4 sm:$0xff]   ;;  %v3176_v26 = vld [vmem:[#allocation7 + $0x20] ss:$16 sps:$4 sm:$0xff]  }
  0x36   :  { %v3174_v25 = vld [vmem:[#allocation7 + $0x224] ss:$16 sps:$4 sm:$0xff]   ;;  %v3177_v27 = vld [vmem:[#allocation7 + $0x220] ss:$16 sps:$4 sm:$0xff]  }
  0x37   :  { %1680 = vmatpush1.bf16.msra.mxu0 %v3158_v14  ;;  %v3178_v28 = vld [vmem:[#allocation7 + $0x4] ss:$16 sps:$4 sm:$0xff]   ;;  %v3182_v30 = vld [vmem:[#allocation7] ss:$16 sps:$4 sm:$0xff]  }
  0x38   :  { %1731 = vmatpush1.bf16.msra.mxu1 %v3159_v15  ;;  %1681 = vmatprep.subr.bf16.mxu0 %v3160_v16  ;;  %v3180_v29 = vld [vmem:[#allocation7 + $0x204] ss:$16 sps:$4 sm:$0xff]   ;;  %v3183_v31 = vld [vmem:[#allocation7 + $0x200] ss:$16 sps:$4 sm:$0xff]  }
  0x39   :  { %1732 = vmatprep.subr.bf16.mxu1 %v3162_v17  ;;  %v3184_v32 = vld [vmem:[#allocation7 + $0x1e4] ss:$16 sps:$4 sm:$0xff]   ;;  %v3188_v34 = vld [vmem:[#allocation7 + $0x1e0] ss:$16 sps:$4 sm:$0xff]  }
  0x3a   :  { %v3186_v33 = vld [vmem:[#allocation7 + $0x3e4] ss:$16 sps:$4 sm:$0xff]   ;;  %v3189_v35 = vld [vmem:[#allocation7 + $0x3e0] ss:$16 sps:$4 sm:$0xff]  }
  0x3b   :  { %1682 = vmatpush1.bf16.msra.mxu0 %v3164_v18  ;;  %v3190_v36 = vld [vmem:[#allocation7 + $0x1c4] ss:$16 sps:$4 sm:$0xff]   ;;  %v3194_v38 = vld [vmem:[#allocation7 + $0x1c0] ss:$16 sps:$4 sm:$0xff]  }
  0x3c   :  { %1733 = vmatpush1.bf16.msra.mxu1 %v3165_v19  ;;  %1683 = vmatprep.subr.bf16.mxu0 %v3166_v20  ;;  %v3192_v37 = vld [vmem:[#allocation7 + $0x3c4] ss:$16 sps:$4 sm:$0xff]   ;;  %v3195_v39 = vld [vmem:[#allocation7 + $0x3c0] ss:$16 sps:$4 sm:$0xff]  }
  0x3d   :  { %1734 = vmatprep.subr.bf16.mxu1 %v3168_v21  ;;  %v3196_v40 = vld [vmem:[#allocation7 + $0x1a4] ss:$16 sps:$4 sm:$0xff]   ;;  %v3200_v42 = vld [vmem:[#allocation7 + $0x1a0] ss:$16 sps:$4 sm:$0xff]  }
  0x3e   :  { %v3198_v41 = vld [vmem:[#allocation7 + $0x3a4] ss:$16 sps:$4 sm:$0xff]   ;;  %v3201_v43 = vld [vmem:[#allocation7 + $0x3a0] ss:$16 sps:$4 sm:$0xff]  }
  0x3f   :  { %1684 = vmatpush1.bf16.msra.mxu0 %v3170_v22  ;;  %v3202_v44 = vld [vmem:[#allocation7 + $0x184] ss:$16 sps:$4 sm:$0xff]   ;;  %v3206_v50 = vld [vmem:[#allocation7 + $0x180] ss:$16 sps:$4 sm:$0xff]  }
  0x40   :  { %1735 = vmatpush1.bf16.msra.mxu1 %v3171_v23  ;;  %1685 = vmatprep.subr.bf16.mxu0 %v3172_v24  ;;  %v3204_v45 = vld [vmem:[#allocation7 + $0x384] ss:$16 sps:$4 sm:$0xff]   ;;  %v3207_v51 = vld [vmem:[#allocation7 + $0x380] ss:$16 sps:$4 sm:$0xff]  }
  0x41   :  { %1736 = vmatprep.subr.bf16.mxu1 %v3174_v25  ;;  %v3208_v52 = vld [vmem:[#allocation7 + $0x164] ss:$16 sps:$4 sm:$0xff]   ;;  %v3212_v56 = vld [vmem:[#allocation7 + $0x160] ss:$16 sps:$4 sm:$0xff]  }
  0x42   :  { %v3210_v55 = vld [vmem:[#allocation7 + $0x364] ss:$16 sps:$4 sm:$0xff]   ;;  %v3213_v57 = vld [vmem:[#allocation7 + $0x360] ss:$16 sps:$4 sm:$0xff]  }
  0x43   :  { %1686 = vmatpush1.bf16.msra.mxu0 %v3176_v26  ;;  %v3214_v58 = vld [vmem:[#allocation7 + $0x144] ss:$16 sps:$4 sm:$0xff]   ;;  %v3218_v60 = vld [vmem:[#allocation7 + $0x140] ss:$16 sps:$4 sm:$0xff]  }
  0x44   :  { %1737 = vmatpush1.bf16.msra.mxu1 %v3177_v27  ;;  %1687 = vmatprep.subr.bf16.mxu0 %v3178_v28  ;;  %v3216_v59 = vld [vmem:[#allocation7 + $0x344] ss:$16 sps:$4 sm:$0xff]   ;;  %v3219_v61 = vld [vmem:[#allocation7 + $0x340] ss:$16 sps:$4 sm:$0xff]  }
  0x45   :  { %1738 = vmatprep.subr.bf16.mxu1 %v3180_v29  ;;  %v3220_v62 = vld [vmem:[#allocation7 + $0x124] ss:$16 sps:$4 sm:$0xff]   ;;  %v3224_v0 = vld [vmem:[#allocation7 + $0x120] ss:$16 sps:$4 sm:$0xff]  }
  0x46   :  { %v3222_v63 = vld [vmem:[#allocation7 + $0x324] ss:$16 sps:$4 sm:$0xff]   ;;  %v3225_v1 = vld [vmem:[#allocation7 + $0x320] ss:$16 sps:$4 sm:$0xff]  }
  0x47   :  { %1688 = vmatpush1.bf16.msra.mxu0 %v3182_v30  ;;  %v3226_v2 = vld [vmem:[#allocation7 + $0x104] ss:$16 sps:$4 sm:$0xff]   ;;  %v3230_v4 = vld [vmem:[#allocation7 + $0x100] ss:$16 sps:$4 sm:$0xff]  }
  0x48   :  { %1739 = vmatpush1.bf16.msra.mxu1 %v3183_v31  ;;  %1689 = vmatprep.subr.bf16.mxu0 %v3184_v32  ;;  %v3228_v3 = vld [vmem:[#allocation7 + $0x304] ss:$16 sps:$4 sm:$0xff]   ;;  %v3231_v5 = vld [vmem:[#allocation7 + $0x300] ss:$16 sps:$4 sm:$0xff]  }
  0x49   :  { %1740 = vmatprep.subr.bf16.mxu1 %v3186_v33  ;;  %v85_v6 = vld [vmem:[#allocation4] sm:$0xff]  ;;  %v87_v8 = vld [vmem:[#allocation4 + $0x10] sm:$0xff]  ;;  %v102_v33 = vld [vmem:[#allocation4 + $0x88] sm:$0xff] }
  0x4a   :  { %v93_v7 = vld [vmem:[#allocation4 + $0x40] sm:$0xff]  ;;  %v95_v9 = vld [vmem:[#allocation4 + $0x50] sm:$0xff] }
  0x4b   :  { %1690 = vmatpush2.bf16.msra.mxu0 %v3188_v34  ;;  %v3234_v10 = vld [vmem:[#allocation7 + $0x4e4] ss:$16 sps:$4 sm:$0xff]   ;;  %v3779_v12 = vpack.c.bf16 %v93_v7, %v85_v6  ;;  %v3781_v13 = vpack.c.bf16 %v95_v9, %v87_v8  ;;  %v3232_v14 = vld [vmem:[#allocation7 + $0x4e0] ss:$16 sps:$4 sm:$0xff]  }
  0x4c   :  { %1741 = vmatpush2.bf16.msra.mxu1 %v3189_v35  ;;  %1691 = vmatprep.subr.bf16.mxu0 %v3190_v36  ;;  %v3237_v11 = vld [vmem:[#allocation7 + $0x6e4] ss:$16 sps:$4 sm:$0xff]   ;;  %v3235_v15 = vld [vmem:[#allocation7 + $0x6e0] ss:$16 sps:$4 sm:$0xff]   ;;  %v104_v35 = vld [vmem:[#allocation4 + $0x98] sm:$0xff] }
  0x4d   :  { %1742 = vmatprep.subr.bf16.mxu1 %v3192_v37  ;;  %v3240_v16 = vld [vmem:[#allocation7 + $0x4c4] ss:$16 sps:$4 sm:$0xff]   ;;  %v3238_v18 = vld [vmem:[#allocation7 + $0x4c0] ss:$16 sps:$4 sm:$0xff]   ;;  %v3785_v37 = vpack.c.bf16 %v102_v33, %v102_v33 }
  0x4e   :  { %v3243_v17 = vld [vmem:[#allocation7 + $0x6c4] ss:$16 sps:$4 sm:$0xff]   ;;  %v3241_v19 = vld [vmem:[#allocation7 + $0x6c0] ss:$16 sps:$4 sm:$0xff]  }
  0x4f   :  { %1692 = vmatpush2.bf16.msra.mxu0 %v3194_v38  ;;  %v3246_v20 = vld [vmem:[#allocation7 + $0x4a4] ss:$16 sps:$4 sm:$0xff]   ;;  %v3244_v22 = vld [vmem:[#allocation7 + $0x4a0] ss:$16 sps:$4 sm:$0xff]   ;;  %v3787_v38 = vpack.c.bf16 %v104_v35, %v104_v35  ;;  %v3333_v35 = vld [vmem:[#allocation7 + $0x2ec] ss:$16 sps:$4 sm:$0xff]  }
  0x50   :  { %1743 = vmatpush2.bf16.msra.mxu1 %v3195_v39  ;;  %1693 = vmatprep.subr.bf16.mxu0 %v3196_v40  ;;  %v3249_v21 = vld [vmem:[#allocation7 + $0x6a4] ss:$16 sps:$4 sm:$0xff]   ;;  %v3247_v23 = vld [vmem:[#allocation7 + $0x6a0] ss:$16 sps:$4 sm:$0xff]  }
  0x51   :  { %1744 = vmatprep.subr.bf16.mxu1 %v3198_v41  ;;  %v3252_v24 = vld [vmem:[#allocation7 + $0x484] ss:$16 sps:$4 sm:$0xff]   ;;  %v3250_v26 = vld [vmem:[#allocation7 + $0x480] ss:$16 sps:$4 sm:$0xff]  }
  0x52   :  { %v3255_v25 = vld [vmem:[#allocation7 + $0x684] ss:$16 sps:$4 sm:$0xff]   ;;  %v3253_v27 = vld [vmem:[#allocation7 + $0x680] ss:$16 sps:$4 sm:$0xff]  }
  0x53   :  { %1694 = vmatpush2.bf16.msra.mxu0 %v3200_v42  ;;  %v3258_v28 = vld [vmem:[#allocation7 + $0x464] ss:$16 sps:$4 sm:$0xff]   ;;  %v3256_v30 = vld [vmem:[#allocation7 + $0x460] ss:$16 sps:$4 sm:$0xff]  }
  0x54   :  { %1745 = vmatpush2.bf16.msra.mxu1 %v3201_v43  ;;  %1695 = vmatprep.subr.bf16.mxu0 %v3202_v44  ;;  %v3261_v29 = vld [vmem:[#allocation7 + $0x664] ss:$16 sps:$4 sm:$0xff]   ;;  %v3259_v31 = vld [vmem:[#allocation7 + $0x660] ss:$16 sps:$4 sm:$0xff]  }
  0x55   :  { %1746 = vmatprep.subr.bf16.mxu1 %v3204_v45  ;;  %v3264_v32 = vld [vmem:[#allocation7 + $0x444] ss:$16 sps:$4 sm:$0xff]   ;;  %v3262_v40 = vld [vmem:[#allocation7 + $0x440] ss:$16 sps:$4 sm:$0xff]  }
  0x56   :  { %v101_v34 = vld [vmem:[#allocation4 + $0x80] sm:$0xff]  ;;  %v103_v42 = vld [vmem:[#allocation4 + $0x90] sm:$0xff] }
  0x57   :  { %1696 = vmatpush2.bf16.msra.mxu0 %v3206_v50  ;;  %v3267_v36 = vld [vmem:[#allocation7 + $0x644] ss:$16 sps:$4 sm:$0xff]   ;;  %v3789_v39 = vpack.c.bf16 %v101_v34, %v101_v34  ;;  %v3265_v41 = vld [vmem:[#allocation7 + $0x640] ss:$16 sps:$4 sm:$0xff]   ;;  %v3793_v44 = vpack.c.bf16 %v103_v42, %v103_v42  ;;  %v90_v50 = vld [vmem:[#allocation4 + $0x28] sm:$0xff] }
  0x58   :  { %1747 = vmatpush2.bf16.msra.mxu1 %v3207_v51  ;;  %1697 = vmatprep.subr.bf16.mxu0 %v3208_v52  ;;  %v3270_v43 = vld [vmem:[#allocation7 + $0x424] ss:$16 sps:$4 sm:$0xff]   ;;  %v3268_v46 = vld [vmem:[#allocation7 + $0x420] ss:$16 sps:$4 sm:$0xff]   ;;  %v98_v51 = vld [vmem:[#allocation4 + $0x68] sm:$0xff] }
  0x59   :  { %1748 = vmatprep.subr.bf16.mxu1 %v3210_v55  ;;  %v3273_v45 = vld [vmem:[#allocation7 + $0x624] ss:$16 sps:$4 sm:$0xff]   ;;  %v3271_v47 = vld [vmem:[#allocation7 + $0x620] ss:$16 sps:$4 sm:$0xff]   ;;  %v3797_v52 = vpack.c.bf16 %v98_v51, %v90_v50  ;;  %v92_v55 = vld [vmem:[#allocation4 + $0x38] sm:$0xff] }
  0x5a   :  { %v3276_v48 = vld [vmem:[#allocation7 + $0x404] ss:$16 sps:$4 sm:$0xff]   ;;  %v3292_v6 = vld [vmem:[#allocation7 + $0x5a0] ss:$16 sps:$4 sm:$0xff]   ;;  %v3330_v34 = vld [vmem:[#allocation7 + $0xec] ss:$16 sps:$4 sm:$0xff]  }
  0x5b   :  { %1698 = vmatpush2.bf16.msra.mxu0 %v3212_v56  ;;  %v3279_v49 = vld [vmem:[#allocation7 + $0x604] ss:$16 sps:$4 sm:$0xff]   ;;  %v100_v56 = vld [vmem:[#allocation4 + $0x78] sm:$0xff]  ;;  %v3295_v7 = vld [vmem:[#allocation7 + $0x7a0] ss:$16 sps:$4 sm:$0xff]  }
  0x5c   :  { %1749 = vmatpush2.bf16.msra.mxu1 %v3213_v57  ;;  %1699 = vmatprep.subr.bf16.mxu0 %v3214_v58  ;;  %v3274_v57 = vld [vmem:[#allocation7 + $0x400] ss:$16 sps:$4 sm:$0xff]   ;;  %v3300_v8 = vld [vmem:[#allocation7 + $0x584] ss:$16 sps:$4 sm:$0xff]  }
  0x5d   :  { %1750 = vmatprep.subr.bf16.mxu1 %v3216_v59  ;;  %v3277_v58 = vld [vmem:[#allocation7 + $0x600] ss:$16 sps:$4 sm:$0xff]   ;;  %v3799_v59 = vpack.c.bf16 %v100_v56, %v92_v55  ;;  %v3303_v9 = vld [vmem:[#allocation7 + $0x784] ss:$16 sps:$4 sm:$0xff]   ;;  %v3342_v56 = vld [vmem:[#allocation7 + $0xac] ss:$16 sps:$4 sm:$0xff]  }
  0x5e   :  { %v99_v33 = vld [vmem:[#allocation4 + $0x70] sm:$0xff]  ;;  %v105_v55 = vld [vmem:[#allocation4 + $0xa0] sm:$0xff] }
  0x5f   :  { %1700 = vmatpush2.bf16.msra.mxu0 %v3218_v60  ;;  %v3282_v60 = vld [vmem:[#allocation7 + $0x5e4] ss:$16 sps:$4 sm:$0xff]  }
  0x60   :  { %1751 = vmatpush2.bf16.msra.mxu1 %v3219_v61  ;;  %1701 = vmatprep.subr.bf16.mxu0 %v3220_v62  ;;  %v3285_v61 = vld [vmem:[#allocation7 + $0x7e4] ss:$16 sps:$4 sm:$0xff]   ;;  %v3280_v62 = vld [vmem:[#allocation7 + $0x5e0] ss:$16 sps:$4 sm:$0xff]  }
  0x61   :  { %1752 = vmatprep.subr.bf16.mxu1 %v3222_v63  ;;  %v3283_v63 = vld [vmem:[#allocation7 + $0x7e0] ss:$16 sps:$4 sm:$0xff]  }
  0x63   :  { %1702 = vmatpush2.bf16.msra.mxu0 %v3224_v0  ;;  %v3288_v0 = vld [vmem:[#allocation7 + $0x5c4] ss:$16 sps:$4 sm:$0xff]  }
  0x64   :  { %1753 = vmatpush2.bf16.msra.mxu1 %v3225_v1  ;;  %1703 = vmatprep.subr.bf16.mxu0 %v3226_v2  ;;  %v3291_v1 = vld [vmem:[#allocation7 + $0x7c4] ss:$16 sps:$4 sm:$0xff]   ;;  %v3286_v2 = vld [vmem:[#allocation7 + $0x5c0] ss:$16 sps:$4 sm:$0xff]  }
  0x65   :  { %1754 = vmatprep.subr.bf16.mxu1 %v3228_v3  ;;  %v3289_v3 = vld [vmem:[#allocation7 + $0x7c0] ss:$16 sps:$4 sm:$0xff]  }
  0x67   :  { %1704 = vmatpush2.bf16.msra.mxu0 %v3230_v4  ;;  %v3294_v4 = vld [vmem:[#allocation7 + $0x5a4] ss:$16 sps:$4 sm:$0xff]  }
  0x68   :  { %1755 = vmatpush2.bf16.msra.mxu1 %v3231_v5  ;;  %1775 = vmatprep.subr.bf16.mxu0 %v3234_v10  ;;  %v3297_v5 = vld [vmem:[#allocation7 + $0x7a4] ss:$16 sps:$4 sm:$0xff]   ;;  %v3298_v10 = vld [vmem:[#allocation7 + $0x580] ss:$16 sps:$4 sm:$0xff]  }
  0x69   :  { %1826 = vmatprep.subr.bf16.mxu1 %v3237_v11  ;;  %v3301_v11 = vld [vmem:[#allocation7 + $0x780] ss:$16 sps:$4 sm:$0xff]  }
  0x6a   :  { %1706 = vmatmul.mubr.bf16.vlgmr.msra.gmra.mxu0 %v3779_v12 }
  0x6b   :  { %1757 = vmatmul.mubr.bf16.vlgmr.msra.gmra.mxu1 %v3781_v13  ;;  %1776 = vmatpush1.bf16.msra.mxu0 %v3232_v14  ;;  %v3306_v14 = vld [vmem:[#allocation7 + $0x564] ss:$16 sps:$4 sm:$0xff]  }
  0x6c   :  { %1827 = vmatpush1.bf16.msra.mxu1 %v3235_v15  ;;  %1777 = vmatprep.subr.bf16.mxu0 %v3240_v16  ;;  %v3309_v15 = vld [vmem:[#allocation7 + $0x764] ss:$16 sps:$4 sm:$0xff]   ;;  %v3304_v16 = vld [vmem:[#allocation7 + $0x560] ss:$16 sps:$4 sm:$0xff]  }
  0x6d   :  { %1828 = vmatprep.subr.bf16.mxu1 %v3243_v17  ;;  %1715 = vmatprep.mubr.bf16.mxu0 %v3785_v37  ;;  %v3307_v17 = vld [vmem:[#allocation7 + $0x760] ss:$16 sps:$4 sm:$0xff]  }
  0x6e   :  { %1766 = vmatprep.mubr.bf16.mxu1 %v3787_v38 }
  0x6f   :  { %1778 = vmatpush1.bf16.msra.mxu0 %v3238_v18  ;;  %v3312_v18 = vld [vmem:[#allocation7 + $0x544] ss:$16 sps:$4 sm:$0xff]  }
  0x70   :  { %1829 = vmatpush1.bf16.msra.mxu1 %v3241_v19  ;;  %1779 = vmatprep.subr.bf16.mxu0 %v3246_v20  ;;  %v3315_v19 = vld [vmem:[#allocation7 + $0x744] ss:$16 sps:$4 sm:$0xff]   ;;  %v3310_v20 = vld [vmem:[#allocation7 + $0x540] ss:$16 sps:$4 sm:$0xff]  }
  0x71   :  { %1830 = vmatprep.subr.bf16.mxu1 %v3249_v21  ;;  %v3313_v21 = vld [vmem:[#allocation7 + $0x740] ss:$16 sps:$4 sm:$0xff]  }
  0x72   :  { %1716 = vmatmul.mubr.bf16.gmra.mxu0 %v3789_v39 }
  0x73   :  { %1780 = vmatpush1.bf16.msra.mxu0 %v3244_v22  ;;  %1767 = vmatmul.mubr.bf16.gmra.mxu1 %v3793_v44  ;;  %v3318_v22 = vld [vmem:[#allocation7 + $0x524] ss:$16 sps:$4 sm:$0xff]  }
  0x74   :  { %1831 = vmatpush1.bf16.msra.mxu1 %v3247_v23  ;;  %1781 = vmatprep.subr.bf16.mxu0 %v3252_v24  ;;  %v3321_v23 = vld [vmem:[#allocation7 + $0x724] ss:$16 sps:$4 sm:$0xff]   ;;  %v3316_v24 = vld [vmem:[#allocation7 + $0x520] ss:$16 sps:$4 sm:$0xff]  }
  0x75   :  { %1832 = vmatprep.subr.bf16.mxu1 %v3255_v25  ;;  %1807 = vmatprep.mubr.bf16.mxu0 %v3797_v52  ;;  %v3319_v25 = vld [vmem:[#allocation7 + $0x720] ss:$16 sps:$4 sm:$0xff]  }
  0x76   :  { %1858 = vmatprep.mubr.bf16.mxu1 %v3799_v59 }
  0x77   :  { %1782 = vmatpush1.bf16.msra.mxu0 %v3250_v26  ;;  %v3324_v26 = vld [vmem:[#allocation7 + $0x504] ss:$16 sps:$4 sm:$0xff]  }
  0x78   :  { %1833 = vmatpush1.bf16.msra.mxu1 %v3253_v27  ;;  %1783 = vmatprep.subr.bf16.mxu0 %v3258_v28  ;;  %v3327_v27 = vld [vmem:[#allocation7 + $0x704] ss:$16 sps:$4 sm:$0xff]   ;;  %v3322_v28 = vld [vmem:[#allocation7 + $0x500] ss:$16 sps:$4 sm:$0xff]  }
  0x79   :  { %1834 = vmatprep.subr.bf16.mxu1 %v3261_v29  ;;  %v3325_v29 = vld [vmem:[#allocation7 + $0x700] ss:$16 sps:$4 sm:$0xff]  }
  0x7b   :  { %1784 = vmatpush1.bf16.msra.mxu0 %v3256_v30  ;;  %v89_v30 = vld [vmem:[#allocation4 + $0x20] sm:$0xff] }
  0x7c   :  { %1835 = vmatpush1.bf16.msra.mxu1 %v3259_v31  ;;  %1785 = vmatprep.subr.bf16.mxu0 %v3264_v32  ;;  %v97_v31 = vld [vmem:[#allocation4 + $0x60] sm:$0xff]  ;;  %v91_v32 = vld [vmem:[#allocation4 + $0x30] sm:$0xff] }
  0x7d   :  { %1836 = vmatprep.subr.bf16.mxu1 %v3267_v36  ;;  %v3328_v36 = vld [vmem:[#allocation7 + $0xe8] ss:$16 sps:$4 sm:$0xff]   ;;  %v3805_v42 = vpack.c.bf16 %v99_v33, %v91_v32  ;;  %v3396_v32 = vld [vmem:[#allocation7 + $0x18c] ss:$16 sps:$4 sm:$0xff]  }
  0x7e   :  { %v3399_v33 = vld [vmem:[#allocation7 + $0x38c] ss:$16 sps:$4 sm:$0xff]  }
  0x7f   :  { %1786 = vmatpush1.bf16.msra.mxu0 %v3262_v40  ;;  %v3331_v40 = vld [vmem:[#allocation7 + $0x2e8] ss:$16 sps:$4 sm:$0xff]  }
  0x80   :  { %1837 = vmatpush1.bf16.msra.mxu1 %v3265_v41  ;;  %1787 = vmatprep.subr.bf16.mxu0 %v3270_v43  ;;  %v3803_v41 = vpack.c.bf16 %v97_v31, %v89_v30  ;;  %v106_v43 = vld [vmem:[#allocation4 + $0xa8] sm:$0xff] }
  0x81   :  { %1838 = vmatprep.subr.bf16.mxu1 %v3273_v45  ;;  %v108_v45 = vld [vmem:[#allocation4 + $0xb8] sm:$0xff]  ;;  %v3807_v50 = vpack.c.bf16 %v106_v43, %v106_v43 }
  0x82   :  { %v3809_v51 = vpack.c.bf16 %v108_v45, %v108_v45  ;;  %v3388_v30 = vld [vmem:[#allocation7 + $0x1a8] ss:$16 sps:$4 sm:$0xff]  }
  0x83   :  { %1788 = vmatpush1.bf16.msra.mxu0 %v3268_v46  ;;  %v3336_v46 = vld [vmem:[#allocation7 + $0xcc] ss:$16 sps:$4 sm:$0xff]   ;;  %v3391_v31 = vld [vmem:[#allocation7 + $0x3a8] ss:$16 sps:$4 sm:$0xff]  }
  0x84   :  { %1839 = vmatpush1.bf16.msra.mxu1 %v3271_v47  ;;  %1789 = vmatprep.subr.bf16.mxu0 %v3276_v48  ;;  %v3339_v47 = vld [vmem:[#allocation7 + $0x2cc] ss:$16 sps:$4 sm:$0xff]   ;;  %v3334_v48 = vld [vmem:[#allocation7 + $0xc8] ss:$16 sps:$4 sm:$0xff]  }
  0x85   :  { %1840 = vmatprep.subr.bf16.mxu1 %v3279_v49  ;;  %v3337_v49 = vld [vmem:[#allocation7 + $0x2c8] ss:$16 sps:$4 sm:$0xff]  }
  0x86   :  { %v3400_v43 = vld [vmem:[#allocation7 + $0x168] ss:$16 sps:$4 sm:$0xff]  }
  0x87   :  { %1790 = vmatpush1.bf16.msra.mxu0 %v3274_v57  ;;  %v107_v57 = vld [vmem:[#allocation4 + $0xb0] sm:$0xff]  ;;  %v3403_v45 = vld [vmem:[#allocation7 + $0x368] ss:$16 sps:$4 sm:$0xff]  }
  0x88   :  { %1841 = vmatpush1.bf16.msra.mxu1 %v3277_v58  ;;  %1791 = vmatprep.subr.bf16.mxu0 %v3282_v60  ;;  %v3345_v58 = vld [vmem:[#allocation7 + $0x2ac] ss:$16 sps:$4 sm:$0xff]   ;;  %v3815_v60 = vpack.c.bf16 %v105_v55, %v105_v55 }
  0x89   :  { %1842 = vmatprep.subr.bf16.mxu1 %v3285_v61  ;;  %v3340_v61 = vld [vmem:[#allocation7 + $0xa8] ss:$16 sps:$4 sm:$0xff]   ;;  %v3414_v55 = vld [vmem:[#allocation7 + $0x12c] ss:$16 sps:$4 sm:$0xff]  }
  0x8b   :  { %1792 = vmatpush2.bf16.msra.mxu0 %v3280_v62  ;;  %v3343_v62 = vld [vmem:[#allocation7 + $0x2a8] ss:$16 sps:$4 sm:$0xff]  }
  0x8c   :  { %1843 = vmatpush2.bf16.msra.mxu1 %v3283_v63  ;;  %1793 = vmatprep.subr.bf16.mxu0 %v3288_v0  ;;  %v3817_v63 = vpack.c.bf16 %v107_v57, %v107_v57  ;;  %v3348_v0 = vld [vmem:[#allocation7 + $0x8c] ss:$16 sps:$4 sm:$0xff]   ;;  %v3412_v57 = vld [vmem:[#allocation7 + $0x128] ss:$16 sps:$4 sm:$0xff]  }
  0x8d   :  { %1844 = vmatprep.subr.bf16.mxu1 %v3291_v1  ;;  %v3351_v1 = vld [vmem:[#allocation7 + $0x28c] ss:$16 sps:$4 sm:$0xff]  }
  0x8f   :  { %1794 = vmatpush2.bf16.msra.mxu0 %v3286_v2  ;;  %v3346_v2 = vld [vmem:[#allocation7 + $0x88] ss:$16 sps:$4 sm:$0xff]  }
  0x90   :  { %1845 = vmatpush2.bf16.msra.mxu1 %v3289_v3  ;;  %1795 = vmatprep.subr.bf16.mxu0 %v3294_v4  ;;  %v3349_v3 = vld [vmem:[#allocation7 + $0x288] ss:$16 sps:$4 sm:$0xff]   ;;  %v3354_v4 = vld [vmem:[#allocation7 + $0x6c] ss:$16 sps:$4 sm:$0xff]  }
  0x91   :  { %1846 = vmatprep.subr.bf16.mxu1 %v3297_v5  ;;  %v3357_v5 = vld [vmem:[#allocation7 + $0x26c] ss:$16 sps:$4 sm:$0xff]  }
  0x93   :  { %1796 = vmatpush2.bf16.msra.mxu0 %v3292_v6  ;;  %v3352_v6 = vld [vmem:[#allocation7 + $0x68] ss:$16 sps:$4 sm:$0xff]  }
  0x94   :  { %1847 = vmatpush2.bf16.msra.mxu1 %v3295_v7  ;;  %1797 = vmatprep.subr.bf16.mxu0 %v3300_v8  ;;  %v3355_v7 = vld [vmem:[#allocation7 + $0x268] ss:$16 sps:$4 sm:$0xff]   ;;  %v3360_v8 = vld [vmem:[#allocation7 + $0x4c] ss:$16 sps:$4 sm:$0xff]  }
  0x95   :  { %1848 = vmatprep.subr.bf16.mxu1 %v3303_v9  ;;  %v3363_v9 = vld [vmem:[#allocation7 + $0x24c] ss:$16 sps:$4 sm:$0xff]  }
  0x97   :  { %1798 = vmatpush2.bf16.msra.mxu0 %v3298_v10  ;;  %v3358_v10 = vld [vmem:[#allocation7 + $0x48] ss:$16 sps:$4 sm:$0xff]  }
  0x98   :  { %1849 = vmatpush2.bf16.msra.mxu1 %v3301_v11  ;;  %1799 = vmatprep.subr.bf16.mxu0 %v3306_v14  ;;  %v3361_v11 = vld [vmem:[#allocation7 + $0x248] ss:$16 sps:$4 sm:$0xff]   ;;  %v3366_v14 = vld [vmem:[#allocation7 + $0x2c] ss:$16 sps:$4 sm:$0xff]  }
  0x99   :  { %1850 = vmatprep.subr.bf16.mxu1 %v3309_v15  ;;  %v3369_v15 = vld [vmem:[#allocation7 + $0x22c] ss:$16 sps:$4 sm:$0xff]  }
  0x9b   :  { %1800 = vmatpush2.bf16.msra.mxu0 %v3304_v16  ;;  %v3364_v16 = vld [vmem:[#allocation7 + $0x28] ss:$16 sps:$4 sm:$0xff]  }
  0x9c   :  { %1851 = vmatpush2.bf16.msra.mxu1 %v3307_v17  ;;  %1801 = vmatprep.subr.bf16.mxu0 %v3312_v18  ;;  %v3375_v17 = vld [vmem:[#allocation7 + $0x20c] ss:$16 sps:$4 sm:$0xff]   ;;  %v3370_v18 = vld [vmem:[#allocation7 + $0x8] ss:$16 sps:$4 sm:$0xff]  }
  0x9d   :  { %1852 = vmatprep.subr.bf16.mxu1 %v3315_v19  ;;  %v3373_v19 = vld [vmem:[#allocation7 + $0x208] ss:$16 sps:$4 sm:$0xff]  }
  0x9f   :  { %1802 = vmatpush2.bf16.msra.mxu0 %v3310_v20  ;;  %v3378_v20 = vld [vmem:[#allocation7 + $0x1ec] ss:$16 sps:$4 sm:$0xff]  }
  0xa0   :  { %1853 = vmatpush2.bf16.msra.mxu1 %v3313_v21  ;;  %1803 = vmatprep.subr.bf16.mxu0 %v3318_v22  ;;  %v3381_v21 = vld [vmem:[#allocation7 + $0x3ec] ss:$16 sps:$4 sm:$0xff]   ;;  %v3376_v22 = vld [vmem:[#allocation7 + $0x1e8] ss:$16 sps:$4 sm:$0xff]  }
  0xa1   :  { %1854 = vmatprep.subr.bf16.mxu1 %v3321_v23  ;;  %v3379_v23 = vld [vmem:[#allocation7 + $0x3e8] ss:$16 sps:$4 sm:$0xff]  }
  0xa3   :  { %1804 = vmatpush2.bf16.msra.mxu0 %v3316_v24  ;;  %v3384_v24 = vld [vmem:[#allocation7 + $0x1cc] ss:$16 sps:$4 sm:$0xff]  }
  0xa4   :  { %1855 = vmatpush2.bf16.msra.mxu1 %v3319_v25  ;;  %1805 = vmatprep.subr.bf16.mxu0 %v3324_v26  ;;  %v3387_v25 = vld [vmem:[#allocation7 + $0x3cc] ss:$16 sps:$4 sm:$0xff]   ;;  %v3382_v26 = vld [vmem:[#allocation7 + $0x1c8] ss:$16 sps:$4 sm:$0xff]  }
  0xa5   :  { %1856 = vmatprep.subr.bf16.mxu1 %v3327_v27  ;;  %v3385_v27 = vld [vmem:[#allocation7 + $0x3c8] ss:$16 sps:$4 sm:$0xff]  }
  0xa7   :  { %1806 = vmatpush2.bf16.msra.mxu0 %v3322_v28  ;;  %v3390_v28 = vld [vmem:[#allocation7 + $0x1ac] ss:$16 sps:$4 sm:$0xff]  }
  0xa8   :  { %1857 = vmatpush2.bf16.msra.mxu1 %v3325_v29  ;;  %1877 = vmatprep.subr.bf16.mxu0 %v3330_v34  ;;  %v3393_v29 = vld [vmem:[#allocation7 + $0x3ac] ss:$16 sps:$4 sm:$0xff]   ;;  %v3394_v34 = vld [vmem:[#allocation7 + $0x188] ss:$16 sps:$4 sm:$0xff]  }
  0xa9   :  { %1928 = vmatprep.subr.bf16.mxu1 %v3333_v35  ;;  %v3397_v35 = vld [vmem:[#allocation7 + $0x388] ss:$16 sps:$4 sm:$0xff]  }
  0xaa   :  { %1808 = vmatmul.mubr.bf16.vlgmr.msra.gmra.mxu0 %v3803_v41 }
  0xab   :  { %1859 = vmatmul.mubr.bf16.vlgmr.msra.gmra.mxu1 %v3805_v42  ;;  %1878 = vmatpush1.bf16.msra.mxu0 %v3328_v36  ;;  %v3402_v36 = vld [vmem:[#allocation7 + $0x16c] ss:$16 sps:$4 sm:$0xff]  }
  0xac   :  { %1929 = vmatpush1.bf16.msra.mxu1 %v3331_v40  ;;  %1879 = vmatprep.subr.bf16.mxu0 %v3336_v46  ;;  %v3405_v40 = vld [vmem:[#allocation7 + $0x36c] ss:$16 sps:$4 sm:$0xff]  }
  0xad   :  { %1930 = vmatprep.subr.bf16.mxu1 %v3339_v47  ;;  %1817 = vmatprep.mubr.bf16.mxu0 %v3807_v50  ;;  %v3408_v46 = vld [vmem:[#allocation7 + $0x14c] ss:$16 sps:$4 sm:$0xff]  }
  0xae   :  { %1868 = vmatprep.mubr.bf16.mxu1 %v3809_v51  ;;  %v3411_v47 = vld [vmem:[#allocation7 + $0x34c] ss:$16 sps:$4 sm:$0xff]  }
  0xaf   :  { %1880 = vmatpush1.bf16.msra.mxu0 %v3334_v48  ;;  %v3406_v48 = vld [vmem:[#allocation7 + $0x148] ss:$16 sps:$4 sm:$0xff]  }
  0xb0   :  { %1931 = vmatpush1.bf16.msra.mxu1 %v3337_v49  ;;  %1881 = vmatprep.subr.bf16.mxu0 %v3342_v56  ;;  %v3409_v49 = vld [vmem:[#allocation7 + $0x348] ss:$16 sps:$4 sm:$0xff]   ;;  %v3417_v56 = vld [vmem:[#allocation7 + $0x32c] ss:$16 sps:$4 sm:$0xff]  }
  0xb1   :  { %1932 = vmatprep.subr.bf16.mxu1 %v3345_v58  ;;  %v3415_v58 = vld [vmem:[#allocation7 + $0x328] ss:$16 sps:$4 sm:$0xff]  }
  0xb2   :  { %1818 = vmatmul.mubr.bf16.gmra.mxu0 %v3815_v60 }
  0xb3   :  { %1869 = vmatmul.mubr.bf16.gmra.mxu1 %v3817_v63  ;;  %1882 = vmatpush1.bf16.msra.mxu0 %v3340_v61  ;;  %v3420_v61 = vld [vmem:[#allocation7 + $0x10c] ss:$16 sps:$4 sm:$0xff]  }
  0xb4   :  { %1933 = vmatpush1.bf16.msra.mxu1 %v3343_v62  ;;  %1883 = vmatprep.subr.bf16.mxu0 %v3348_v0  ;;  %v3423_v62 = vld [vmem:[#allocation7 + $0x30c] ss:$16 sps:$4 sm:$0xff]   ;;  %v3418_v0 = vld [vmem:[#allocation7 + $0x108] ss:$16 sps:$4 sm:$0xff]  }
  0xb5   :  { %1934 = vmatprep.subr.bf16.mxu1 %v3351_v1  ;;  %1909 = vmatprep.mubr.bf16.mxu0 %v3773_v53  ;;  %v3367_v53 = vld [vmem:[#allocation7 + $0x228] ss:$16 sps:$4 sm:$0xff]  }
  0xb6   :  { %1960 = vmatprep.mubr.bf16.mxu1 %v3775_v54  ;;  %v3372_v54 = vld [vmem:[#allocation7 + $0xc] ss:$16 sps:$4 sm:$0xff]   ;;  %v3421_v1 = vld [vmem:[#allocation7 + $0x308] ss:$16 sps:$4 sm:$0xff]  }
  0xb7   :  { %1884 = vmatpush1.bf16.msra.mxu0 %v3346_v2  ;;  %v3426_v2 = vld [vmem:[#allocation7 + $0x4ec] ss:$16 sps:$4 sm:$0xff]  }
  0xb8   :  { %1935 = vmatpush1.bf16.msra.mxu1 %v3349_v3  ;;  %1885 = vmatprep.subr.bf16.mxu0 %v3354_v4  ;;  %v3429_v3 = vld [vmem:[#allocation7 + $0x6ec] ss:$16 sps:$4 sm:$0xff]   ;;  %v3424_v4 = vld [vmem:[#allocation7 + $0x4e8] ss:$16 sps:$4 sm:$0xff]  }
  0xb9   :  { %1936 = vmatprep.subr.bf16.mxu1 %v3357_v5  ;;  %v3427_v5 = vld [vmem:[#allocation7 + $0x6e8] ss:$16 sps:$4 sm:$0xff]  }
  0xbb   :  { %1886 = vmatpush1.bf16.msra.mxu0 %v3352_v6  ;;  %v3432_v6 = vld [vmem:[#allocation7 + $0x4cc] ss:$16 sps:$4 sm:$0xff]  }
  0xbc   :  { %1937 = vmatpush1.bf16.msra.mxu1 %v3355_v7  ;;  %1887 = vmatprep.subr.bf16.mxu0 %v3360_v8  ;;  %v3435_v7 = vld [vmem:[#allocation7 + $0x6cc] ss:$16 sps:$4 sm:$0xff]   ;;  %v3430_v8 = vld [vmem:[#allocation7 + $0x4c8] ss:$16 sps:$4 sm:$0xff]  }
  0xbd   :  { %1938 = vmatprep.subr.bf16.mxu1 %v3363_v9  ;;  %v3433_v9 = vld [vmem:[#allocation7 + $0x6c8] ss:$16 sps:$4 sm:$0xff]  }
  0xbf   :  { %1888 = vmatpush1.bf16.msra.mxu0 %v3358_v10  ;;  %v3438_v10 = vld [vmem:[#allocation7 + $0x4ac] ss:$16 sps:$4 sm:$0xff]  }
  0xc0   :  { %1939 = vmatpush1.bf16.msra.mxu1 %v3361_v11  ;;  %1889 = vmatprep.subr.bf16.mxu0 %v3366_v14  ;;  %v3441_v11 = vld [vmem:[#allocation7 + $0x6ac] ss:$16 sps:$4 sm:$0xff]   ;;  %v3436_v14 = vld [vmem:[#allocation7 + $0x4a8] ss:$16 sps:$4 sm:$0xff]  }
  0xc1   :  { %1940 = vmatprep.subr.bf16.mxu1 %v3369_v15  ;;  %v3439_v15 = vld [vmem:[#allocation7 + $0x6a8] ss:$16 sps:$4 sm:$0xff]  }
  0xc3   :  { %1890 = vmatpush1.bf16.msra.mxu0 %v3364_v16  ;;  %v3444_v16 = vld [vmem:[#allocation7 + $0x48c] ss:$16 sps:$4 sm:$0xff]  }
  0xc4   :  { %1941 = vmatpush1.bf16.msra.mxu1 %v3367_v53  ;;  %1891 = vmatprep.subr.bf16.mxu0 %v3372_v54  ;;  %v3445_v53 = vld [vmem:[#allocation7 + $0x688] ss:$16 sps:$4 sm:$0xff]   ;;  %v3450_v54 = vld [vmem:[#allocation7 + $0x46c] ss:$16 sps:$4 sm:$0xff]  }
  0xc5   :  { %1942 = vmatprep.subr.bf16.mxu1 %v3375_v17  ;;  %v3448_v17 = vld [vmem:[#allocation7 + $0x468] ss:$16 sps:$4 sm:$0xff]  }
  0xc7   :  { %1892 = vmatpush1.bf16.msra.mxu0 %v3370_v18  ;;  %v3456_v18 = vld [vmem:[#allocation7 + $0x44c] ss:$16 sps:$4 sm:$0xff]  }
  0xc8   :  { %1943 = vmatpush1.bf16.msra.mxu1 %v3373_v19  ;;  %1893 = vmatprep.subr.bf16.mxu0 %v3378_v20  ;;  %v3459_v19 = vld [vmem:[#allocation7 + $0x64c] ss:$16 sps:$4 sm:$0xff]  }
  0xc9   :  { %1944 = vmatprep.subr.bf16.mxu1 %v3381_v21  ;;  %v3462_v20 = vld [vmem:[#allocation7 + $0x42c] ss:$16 sps:$4 sm:$0xff]  }
  0xca   :  { %v3465_v21 = vld [vmem:[#allocation7 + $0x62c] ss:$16 sps:$4 sm:$0xff]  }
  0xcb   :  { %1894 = vmatpush2.bf16.msra.mxu0 %v3376_v22  ;;  %v3460_v22 = vld [vmem:[#allocation7 + $0x428] ss:$16 sps:$4 sm:$0xff]  }
  0xcc   :  { %1945 = vmatpush2.bf16.msra.mxu1 %v3379_v23  ;;  %1895 = vmatprep.subr.bf16.mxu0 %v3384_v24  ;;  %v3471_v23 = vld [vmem:[#allocation7 + $0x60c] ss:$16 sps:$4 sm:$0xff]   ;;  %v3466_v24 = vld [vmem:[#allocation7 + $0x408] ss:$16 sps:$4 sm:$0xff]  }
  0xcd   :  { %1946 = vmatprep.subr.bf16.mxu1 %v3387_v25  ;;  %v3469_v25 = vld [vmem:[#allocation7 + $0x608] ss:$16 sps:$4 sm:$0xff]  }
  0xcf   :  { %1896 = vmatpush2.bf16.msra.mxu0 %v3382_v26  ;;  %v3474_v26 = vld [vmem:[#allocation7 + $0x5ec] ss:$16 sps:$4 sm:$0xff]  }
  0xd0   :  { %1947 = vmatpush2.bf16.msra.mxu1 %v3385_v27  ;;  %1897 = vmatprep.subr.bf16.mxu0 %v3390_v28  ;;  %v3477_v27 = vld [vmem:[#allocation7 + $0x7ec] ss:$16 sps:$4 sm:$0xff]   ;;  %v3472_v28 = vld [vmem:[#allocation7 + $0x5e8] ss:$16 sps:$4 sm:$0xff]  }
  0xd1   :  { %1948 = vmatprep.subr.bf16.mxu1 %v3393_v29  ;;  %v3475_v29 = vld [vmem:[#allocation7 + $0x7e8] ss:$16 sps:$4 sm:$0xff]  }
  0xd3   :  { %1898 = vmatpush2.bf16.msra.mxu0 %v3388_v30  ;;  %v3480_v30 = vld [vmem:[#allocation7 + $0x5cc] ss:$16 sps:$4 sm:$0xff]  }
  0xd4   :  { %1949 = vmatpush2.bf16.msra.mxu1 %v3391_v31  ;;  %1899 = vmatprep.subr.bf16.mxu0 %v3396_v32  ;;  %v3483_v31 = vld [vmem:[#allocation7 + $0x7cc] ss:$16 sps:$4 sm:$0xff]   ;;  %v3478_v32 = vld [vmem:[#allocation7 + $0x5c8] ss:$16 sps:$4 sm:$0xff]  }
  0xd5   :  { %1950 = vmatprep.subr.bf16.mxu1 %v3399_v33  ;;  %v3481_v33 = vld [vmem:[#allocation7 + $0x7c8] ss:$16 sps:$4 sm:$0xff]  }
  0xd7   :  { %1900 = vmatpush2.bf16.msra.mxu0 %v3394_v34  ;;  %v3486_v34 = vld [vmem:[#allocation7 + $0x5ac] ss:$16 sps:$4 sm:$0xff]  }
  0xd8   :  { %1951 = vmatpush2.bf16.msra.mxu1 %v3397_v35  ;;  %1901 = vmatprep.subr.bf16.mxu0 %v3402_v36  ;;  %v3489_v35 = vld [vmem:[#allocation7 + $0x7ac] ss:$16 sps:$4 sm:$0xff]   ;;  %v3484_v36 = vld [vmem:[#allocation7 + $0x5a8] ss:$16 sps:$4 sm:$0xff]  }
  0xd9   :  { %1952 = vmatprep.subr.bf16.mxu1 %v3405_v40  ;;  %v3487_v40 = vld [vmem:[#allocation7 + $0x7a8] ss:$16 sps:$4 sm:$0xff]  }
  0xdb   :  { %1902 = vmatpush2.bf16.msra.mxu0 %v3400_v43  ;;  %v3492_v43 = vld [vmem:[#allocation7 + $0x58c] ss:$16 sps:$4 sm:$0xff]  }
  0xdc   :  { %1953 = vmatpush2.bf16.msra.mxu1 %v3403_v45  ;;  %1903 = vmatprep.subr.bf16.mxu0 %v3408_v46  ;;  %v3495_v45 = vld [vmem:[#allocation7 + $0x78c] ss:$16 sps:$4 sm:$0xff]   ;;  %v3490_v46 = vld [vmem:[#allocation7 + $0x588] ss:$16 sps:$4 sm:$0xff]  }
  0xdd   :  { %1954 = vmatprep.subr.bf16.mxu1 %v3411_v47  ;;  %v3493_v47 = vld [vmem:[#allocation7 + $0x788] ss:$16 sps:$4 sm:$0xff]  }
  0xdf   :  { %1904 = vmatpush2.bf16.msra.mxu0 %v3406_v48  ;;  %v3498_v48 = vld [vmem:[#allocation7 + $0x56c] ss:$16 sps:$4 sm:$0xff]  }
  0xe0   :  { %1955 = vmatpush2.bf16.msra.mxu1 %v3409_v49  ;;  %1905 = vmatprep.subr.bf16.mxu0 %v3414_v55  ;;  %v3501_v49 = vld [vmem:[#allocation7 + $0x76c] ss:$16 sps:$4 sm:$0xff]   ;;  %v3496_v55 = vld [vmem:[#allocation7 + $0x568] ss:$16 sps:$4 sm:$0xff]  }
  0xe1   :  { %1956 = vmatprep.subr.bf16.mxu1 %v3417_v56  ;;  %v3499_v56 = vld [vmem:[#allocation7 + $0x768] ss:$16 sps:$4 sm:$0xff]  }
  0xe3   :  { %1906 = vmatpush2.bf16.msra.mxu0 %v3412_v57  ;;  %v3504_v57 = vld [vmem:[#allocation7 + $0x54c] ss:$16 sps:$4 sm:$0xff]  }
  0xe4   :  { %1957 = vmatpush2.bf16.msra.mxu1 %v3415_v58  ;;  %1907 = vmatprep.subr.bf16.mxu0 %v3420_v61  ;;  %v3507_v58 = vld [vmem:[#allocation7 + $0x74c] ss:$16 sps:$4 sm:$0xff]   ;;  %v3502_v61 = vld [vmem:[#allocation7 + $0x548] ss:$16 sps:$4 sm:$0xff]  }
  0xe5   :  { %1958 = vmatprep.subr.bf16.mxu1 %v3423_v62  ;;  %v3505_v62 = vld [vmem:[#allocation7 + $0x748] ss:$16 sps:$4 sm:$0xff]  }
  0xe7   :  { %1908 = vmatpush2.bf16.msra.mxu0 %v3418_v0  ;;  %v3510_v0 = vld [vmem:[#allocation7 + $0x52c] ss:$16 sps:$4 sm:$0xff]  }
  0xe8   :  { %1959 = vmatpush2.bf16.msra.mxu1 %v3421_v1  ;;  %1979 = vmatprep.subr.bf16.mxu0 %v3426_v2  ;;  %v3513_v1 = vld [vmem:[#allocation7 + $0x72c] ss:$16 sps:$4 sm:$0xff]   ;;  %v3508_v2 = vld [vmem:[#allocation7 + $0x528] ss:$16 sps:$4 sm:$0xff]  }
  0xe9   :  { %2030 = vmatprep.subr.bf16.mxu1 %v3429_v3  ;;  %v3511_v3 = vld [vmem:[#allocation7 + $0x728] ss:$16 sps:$4 sm:$0xff]  }
  0xea   :  { %1910 = vmatmul.mubr.bf16.vlgmr.msra.gmra.mxu0 %v3779_v12  ;;  %v3447_v12 = vld [vmem:[#allocation7 + $0x68c] ss:$16 sps:$4 sm:$0xff]  }
  0xeb   :  { %1961 = vmatmul.mubr.bf16.vlgmr.msra.gmra.mxu1 %v3781_v13  ;;  %1980 = vmatpush1.bf16.msra.mxu0 %v3424_v4  ;;  %v3442_v13 = vld [vmem:[#allocation7 + $0x488] ss:$16 sps:$4 sm:$0xff]   ;;  %v3516_v4 = vld [vmem:[#allocation7 + $0x50c] ss:$16 sps:$4 sm:$0xff]  }
  0xec   :  { %2031 = vmatpush1.bf16.msra.mxu1 %v3427_v5  ;;  %1981 = vmatprep.subr.bf16.mxu0 %v3432_v6  ;;  %v3519_v5 = vld [vmem:[#allocation7 + $0x70c] ss:$16 sps:$4 sm:$0xff]   ;;  %v3514_v6 = vld [vmem:[#allocation7 + $0x508] ss:$16 sps:$4 sm:$0xff]  }
  0xed   :  { %2032 = vmatprep.subr.bf16.mxu1 %v3435_v7  ;;  %1919 = vmatprep.mubr.bf16.mxu0 %v3785_v37  ;;  %v3453_v37 = vld [vmem:[#allocation7 + $0x66c] ss:$16 sps:$4 sm:$0xff]   ;;  %v3517_v7 = vld [vmem:[#allocation7 + $0x708] ss:$16 sps:$4 sm:$0xff]  }
  0xee   :  { %1970 = vmatprep.mubr.bf16.mxu1 %v3787_v38  ;;  %v3451_v38 = vld [vmem:[#allocation7 + $0x668] ss:$16 sps:$4 sm:$0xff]  }
  0xef   :  { %1982 = vmatpush1.bf16.msra.mxu0 %v3430_v8  ;;  %v3522_v8 = vld [vmem:[#allocation9 + $0x74] ss:$8 sps:$4 sm:$0xff]  }
  0xf0   :  { %2033 = vmatpush1.bf16.msra.mxu1 %v3433_v9  ;;  %1983 = vmatprep.subr.bf16.mxu0 %v3438_v10  ;;  %v3520_v9 = vld [vmem:[#allocation9 + $0x70] ss:$8 sps:$4 sm:$0xff]   ;;  %v3525_v10 = vld [vmem:[#allocation9 + $0x64] ss:$8 sps:$4 sm:$0xff]  }
  0xf1   :  { %2034 = vmatprep.subr.bf16.mxu1 %v3441_v11  ;;  %v3523_v11 = vld [vmem:[#allocation9 + $0x60] ss:$8 sps:$4 sm:$0xff]  }
  0xf2   :  { %1920 = vmatmul.mubr.bf16.gmra.mxu0 %v3789_v39  ;;  %v3454_v39 = vld [vmem:[#allocation7 + $0x448] ss:$16 sps:$4 sm:$0xff]  }
  0xf3   :  { %1971 = vmatmul.mubr.bf16.gmra.mxu1 %v3793_v44  ;;  %1984 = vmatpush1.bf16.msra.mxu0 %v3436_v14  ;;  %v3457_v44 = vld [vmem:[#allocation7 + $0x648] ss:$16 sps:$4 sm:$0xff]   ;;  %v3528_v14 = vld [vmem:[#allocation9 + $0x54] ss:$8 sps:$4 sm:$0xff]  }
  0xf4   :  { %2035 = vmatpush1.bf16.msra.mxu1 %v3439_v15  ;;  %1985 = vmatprep.subr.bf16.mxu0 %v3444_v16 }
  0xf5   :  { %2036 = vmatprep.subr.bf16.mxu1 %v3447_v12  ;;  %2011 = vmatprep.mubr.bf16.mxu0 %v3797_v52  ;;  %v3463_v52 = vld [vmem:[#allocation7 + $0x628] ss:$16 sps:$4 sm:$0xff]  }
  0xf6   :  { %2062 = vmatprep.mubr.bf16.mxu1 %v3799_v59  ;;  %v3468_v59 = vld [vmem:[#allocation7 + $0x40c] ss:$16 sps:$4 sm:$0xff]   ;;  %v3526_v12 = vld [vmem:[#allocation9 + $0x50] ss:$8 sps:$4 sm:$0xff]  }
  0xf7   :  { %1986 = vmatpush1.bf16.msra.mxu0 %v3442_v13  ;;  %v3531_v13 = vld [vmem:[#allocation9 + $0x44] ss:$8 sps:$4 sm:$0xff]  }
  0xf8   :  { %2037 = vmatpush1.bf16.msra.mxu1 %v3445_v53  ;;  %1987 = vmatprep.subr.bf16.mxu0 %v3450_v54  ;;  %v3568_v53 = vld [vmem:[#allocation9 + $0x170] ss:$8 sps:$4 sm:$0xff]   ;;  %v3529_v54 = vld [vmem:[#allocation9 + $0x40] ss:$8 sps:$4 sm:$0xff]  }
  0xf9   :  { %2038 = vmatprep.subr.bf16.mxu1 %v3453_v37  ;;  %v3571_v37 = vld [vmem:[#allocation9 + $0x160] ss:$8 sps:$4 sm:$0xff]  }
  0xfb   :  { %1988 = vmatpush1.bf16.msra.mxu0 %v3448_v17  ;;  %v3534_v17 = vld [vmem:[#allocation9 + $0x34] ss:$8 sps:$4 sm:$0xff]  }
  0xfc   :  { %2039 = vmatpush1.bf16.msra.mxu1 %v3451_v38  ;;  %1989 = vmatprep.subr.bf16.mxu0 %v3456_v18  ;;  %v3576_v38 = vld [vmem:[#allocation9 + $0x154] ss:$8 sps:$4 sm:$0xff]  }
  0xfd   :  { %2040 = vmatprep.subr.bf16.mxu1 %v3459_v19 }
  0xff   :  { %1990 = vmatpush1.bf16.msra.mxu0 %v3454_v39  ;;  %v3537_v39 = vld [vmem:[#allocation9 + $0x24] ss:$8 sps:$4 sm:$0xff]  }
 0x100   :  { %2041 = vmatpush1.bf16.msra.mxu1 %v3457_v44  ;;  %1991 = vmatprep.subr.bf16.mxu0 %v3462_v20  ;;  %v3579_v44 = vld [vmem:[#allocation9 + $0x144] ss:$8 sps:$4 sm:$0xff]  }
 0x101   :  { %2042 = vmatprep.subr.bf16.mxu1 %v3465_v21 }
 0x103   :  { %1992 = vmatpush1.bf16.msra.mxu0 %v3460_v22  ;;  %v3535_v22 = vld [vmem:[#allocation9 + $0x20] ss:$8 sps:$4 sm:$0xff]  }
 0x104   :  { %2043 = vmatpush1.bf16.msra.mxu1 %v3463_v52  ;;  %1993 = vmatprep.subr.bf16.mxu0 %v3468_v59  ;;  %v3577_v52 = vld [vmem:[#allocation9 + $0x140] ss:$8 sps:$4 sm:$0xff]   ;;  %v3540_v59 = vld [vmem:[#allocation9 + $0x14] ss:$8 sps:$4 sm:$0xff]  }
 0x105   :  { %2044 = vmatprep.subr.bf16.mxu1 %v3471_v23 }
 0x107   :  { %1994 = vmatpush1.bf16.msra.mxu0 %v3466_v24 }
 0x108   :  { %2045 = vmatpush1.bf16.msra.mxu1 %v3469_v25  ;;  %1995 = vmatprep.subr.bf16.mxu0 %v3474_v26  ;;  %v3582_v25 = vld [vmem:[#allocation9 + $0x134] ss:$8 sps:$4 sm:$0xff]  }
 0x109   :  { %2046 = vmatprep.subr.bf16.mxu1 %v3477_v27 }
 0x10b   :  { %1996 = vmatpush2.bf16.msra.mxu0 %v3472_v28  ;;  %v3538_v28 = vld [vmem:[#allocation9 + $0x10] ss:$8 sps:$4 sm:$0xff]  }
 0x10c   :  { %2047 = vmatpush2.bf16.msra.mxu1 %v3475_v29  ;;  %1997 = vmatprep.subr.bf16.mxu0 %v3480_v30  ;;  %v3580_v29 = vld [vmem:[#allocation9 + $0x130] ss:$8 sps:$4 sm:$0xff]   ;;  %v3543_v30 = vld [vmem:[#allocation9 + $0x4] ss:$8 sps:$4 sm:$0xff]  }
 0x10d   :  { %2048 = vmatprep.subr.bf16.mxu1 %v3483_v31 }
 0x10f   :  { %1998 = vmatpush2.bf16.msra.mxu0 %v3478_v32 }
 0x110   :  { %2049 = vmatpush2.bf16.msra.mxu1 %v3481_v33  ;;  %1999 = vmatprep.subr.bf16.mxu0 %v3486_v34  ;;  %v3585_v33 = vld [vmem:[#allocation9 + $0x124] ss:$8 sps:$4 sm:$0xff]  }
 0x111   :  { %2050 = vmatprep.subr.bf16.mxu1 %v3489_v35 }
 0x113   :  { %2000 = vmatpush2.bf16.msra.mxu0 %v3484_v36  ;;  %v3541_v36 = vld [vmem:[#allocation9] ss:$8 sps:$4 sm:$0xff]  }
 0x114   :  { %2051 = vmatpush2.bf16.msra.mxu1 %v3487_v40  ;;  %2001 = vmatprep.subr.bf16.mxu0 %v3492_v43  ;;  %v3583_v40 = vld [vmem:[#allocation9 + $0x120] ss:$8 sps:$4 sm:$0xff]   ;;  %v3546_v43 = vld [vmem:[#allocation9 + $0xf4] ss:$8 sps:$4 sm:$0xff]  }
 0x115   :  { %2052 = vmatprep.subr.bf16.mxu1 %v3495_v45  ;;  %v3588_v45 = vld [vmem:[#allocation9 + $0x114] ss:$8 sps:$4 sm:$0xff]  }
 0x117   :  { %2002 = vmatpush2.bf16.msra.mxu0 %v3490_v46  ;;  %v3544_v46 = vld [vmem:[#allocation9 + $0xf0] ss:$8 sps:$4 sm:$0xff]  }
 0x118   :  { %2053 = vmatpush2.bf16.msra.mxu1 %v3493_v47  ;;  %2003 = vmatprep.subr.bf16.mxu0 %v3498_v48  ;;  %v3586_v47 = vld [vmem:[#allocation9 + $0x110] ss:$8 sps:$4 sm:$0xff]   ;;  %v3549_v48 = vld [vmem:[#allocation9 + $0xe4] ss:$8 sps:$4 sm:$0xff]  }
 0x119   :  { %2054 = vmatprep.subr.bf16.mxu1 %v3501_v49  ;;  %v3591_v49 = vld [vmem:[#allocation9 + $0x104] ss:$8 sps:$4 sm:$0xff]  }
 0x11b   :  { %2004 = vmatpush2.bf16.msra.mxu0 %v3496_v55  ;;  %v3547_v55 = vld [vmem:[#allocation9 + $0xe0] ss:$8 sps:$4 sm:$0xff]  }
 0x11c   :  { %2055 = vmatpush2.bf16.msra.mxu1 %v3499_v56  ;;  %2005 = vmatprep.subr.bf16.mxu0 %v3504_v57  ;;  %v3589_v56 = vld [vmem:[#allocation9 + $0x100] ss:$8 sps:$4 sm:$0xff]   ;;  %v3552_v57 = vld [vmem:[#allocation9 + $0xd4] ss:$8 sps:$4 sm:$0xff]  }
 0x11d   :  { %2056 = vmatprep.subr.bf16.mxu1 %v3507_v58  ;;  %v3594_v58 = vld [vmem:[#allocation9 + $0x1f4] ss:$8 sps:$4 sm:$0xff]  }
 0x11f   :  { %2006 = vmatpush2.bf16.msra.mxu0 %v3502_v61  ;;  %v3550_v61 = vld [vmem:[#allocation9 + $0xd0] ss:$8 sps:$4 sm:$0xff]  }
 0x120   :  { %2057 = vmatpush2.bf16.msra.mxu1 %v3505_v62  ;;  %2007 = vmatprep.subr.bf16.mxu0 %v3510_v0  ;;  %v3592_v62 = vld [vmem:[#allocation9 + $0x1f0] ss:$8 sps:$4 sm:$0xff]   ;;  %v3555_v0 = vld [vmem:[#allocation9 + $0xc4] ss:$8 sps:$4 sm:$0xff]  }
 0x121   :  { %2058 = vmatprep.subr.bf16.mxu1 %v3513_v1  ;;  %v3597_v1 = vld [vmem:[#allocation9 + $0x1e4] ss:$8 sps:$4 sm:$0xff]  }
 0x123   :  { %2008 = vmatpush2.bf16.msra.mxu0 %v3508_v2  ;;  %v3553_v2 = vld [vmem:[#allocation9 + $0xc0] ss:$8 sps:$4 sm:$0xff]  }
 0x124   :  { %2059 = vmatpush2.bf16.msra.mxu1 %v3511_v3  ;;  %2009 = vmatprep.subr.bf16.mxu0 %v3516_v4  ;;  %v3595_v3 = vld [vmem:[#allocation9 + $0x1e0] ss:$8 sps:$4 sm:$0xff]   ;;  %v3558_v4 = vld [vmem:[#allocation9 + $0xb4] ss:$8 sps:$4 sm:$0xff]  }
 0x125   :  { %2060 = vmatprep.subr.bf16.mxu1 %v3519_v5  ;;  %v3600_v5 = vld [vmem:[#allocation9 + $0x1d4] ss:$8 sps:$4 sm:$0xff]  }
 0x127   :  { %2010 = vmatpush2.bf16.msra.mxu0 %v3514_v6  ;;  %v3556_v6 = vld [vmem:[#allocation9 + $0xb0] ss:$8 sps:$4 sm:$0xff]  }
 0x128   :  { %2061 = vmatpush2.bf16.msra.mxu1 %v3517_v7  ;;  %2594 = vmatprep.subr.bf16.mxu0 %v3522_v8  ;;  %v3598_v7 = vld [vmem:[#allocation9 + $0x1d0] ss:$8 sps:$4 sm:$0xff]   ;;  %v3561_v8 = vld [vmem:[#allocation9 + $0xa4] ss:$8 sps:$4 sm:$0xff]  }
 0x12a   :  { %2012 = vmatmul.mubr.bf16.vlgmr.msra.gmra.mxu0 %v3803_v41  ;;  %v3835_v15 = vpop.f32.mrf.mxu0  ;;  %v3570_v41 = vld [vmem:[#allocation9 + $0x174] ss:$8 sps:$4 sm:$0xff]  }
 0x12b   :  { %2063 = vmatmul.mubr.bf16.vlgmr.msra.gmra.mxu1 %v3805_v42  ;;  %2021 = vmatprep.mubr.bf16.mxu0 %v3807_v50  ;;  %v3837_v16 = vpop.f32.mrf.mxu1  ;;  %v3573_v42 = vld [vmem:[#allocation9 + $0x164] ss:$8 sps:$4 sm:$0xff]  }
 0x12c   :  { %2072 = vmatprep.mubr.bf16.mxu1 %v3809_v51  ;;  %2595 = vmatpush1.bf16.msra.mxu0 %v3520_v9  ;;  %v3841_v50 = vpop.f32.mrf.mxu0  ;;  %v3603_v9 = vld [vmem:[#allocation9 + $0x1c4] ss:$8 sps:$4 sm:$0xff]  }
 0x12d   :  { %2596 = vmatprep.subr.bf16.mxu0 %v3525_v10  ;;  %v3843_v51 = vpop.f32.mrf.mxu1  ;;  %2645 = vmatprep.subr.bf16.mxu1 %v3570_v41  ;;  %v3559_v10 = vld [vmem:[#allocation9 + $0xa0] ss:$8 sps:$4 sm:$0xff]  }
 0x12e   :  { %2646 = vmatpush1.bf16.msra.mxu1 %v3568_v53  ;;  %v3845_v18 = vpop.f32.mrf.mxu0  ;;  %v2122_v53 = vlaneseq  ;;  %v3565_v41 = vld [vmem:[#allocation9 + $0x80] ss:$8 sps:$4 sm:$0xff]  }
 0x12f   :  { %2647 = vmatprep.subr.bf16.mxu1 %v3573_v42  ;;  %v3847_v19 = vpop.f32.mrf.mxu1 }
 0x130   :  { %2597 = vmatpush1.bf16.msra.mxu0 %v3523_v11  ;;  %v3849_v20 = vpop.f32.mrf.mxu0  ;;  %v3601_v11 = vld [vmem:[#allocation9 + $0x1c0] ss:$8 sps:$4 sm:$0xff]   ;;  %v3862_v42 = vshrl.u32 %v2122_v53, 7 }
 0x131   :  { %2598 = vmatprep.subr.bf16.mxu0 %v3528_v14  ;;  %v3851_v21 = vpop.f32.mrf.mxu1  ;;  %v3564_v14 = vld [vmem:[#allocation9 + $0x94] ss:$8 sps:$4 sm:$0xff]  }
 0x132   :  { %2022 = vmatmul.mubr.bf16.gmra.mxu0 %v3815_v60  ;;  %v3532_v60 = vld [vmem:[#allocation9 + $0x30] ss:$8 sps:$4 sm:$0xff]   ;;  %2648 = vmatpush1.bf16.msra.mxu1 %v3571_v37  ;;  %v3853_v23 = vpop.f32.mrf.mxu0 }
 0x133   :  { %2073 = vmatmul.mubr.bf16.gmra.mxu1 %v3817_v63  ;;  %v3574_v63 = vld [vmem:[#allocation9 + $0x150] ss:$8 sps:$4 sm:$0xff]   ;;  %2649 = vmatprep.subr.bf16.mxu1 %v3576_v38  ;;  %v3855_v24 = vpop.f32.mrf.mxu1  ;;  %v3867_v38 = vsub.s32 1, %v3862_v42 }
 0x134   :  { %2599 = vmatpush1.bf16.msra.mxu0 %v3526_v12  ;;  %v3857_v26 = vpop.f32.mrf.mxu0  ;;  %v3562_v12 = vld [vmem:[#allocation9 + $0x90] ss:$8 sps:$4 sm:$0xff]  }
 0x135   :  { %2600 = vmatprep.subr.bf16.mxu0 %v3531_v13  ;;  %v3859_v27 = vpop.f32.mrf.mxu1  ;;  %v3567_v13 = vld [vmem:[#allocation9 + $0x84] ss:$8 sps:$4 sm:$0xff]  }
 0x136   :  { %2650 = vmatpush1.bf16.msra.mxu1 %v3574_v63  ;;  %v1721_v31 = vpop.f32.mrf.mxu0 }
 0x137   :  { %2651 = vmatprep.subr.bf16.mxu1 %v3579_v44  ;;  %v1772_v32 = vpop.f32.mrf.mxu1  ;;  %v3877_v44 = vld [vmem:[%s3918_s2] sm:$0xf] }
 0x138   :  { %2601 = vmatpush1.bf16.msra.mxu0 %v3529_v54  ;;  %v1722_v34 = vpop.f32.mrf.mxu0  ;;  %v1759_v54 = vadd.f32 %v3837_v16, %v3835_v15  ;;  %v3606_v15 = vld [vmem:[#allocation9 + $0x1b4] ss:$8 sps:$4 sm:$0xff]   ;;  %v1763_v16 = vadd.f32 %v3847_v19, %v3845_v18  ;;  %v3609_v19 = vld [vmem:[#allocation9 + $0x1a4] ss:$8 sps:$4 sm:$0xff]  }
 0x139   :  { %2602 = vmatprep.subr.bf16.mxu0 %v3534_v17  ;;  %v1773_v35 = vpop.f32.mrf.mxu1 }
 0x13a   :  { %2652 = vmatpush1.bf16.msra.mxu1 %v3577_v52 }
 0x13b   :  { %2653 = vmatprep.subr.bf16.mxu1 %v3582_v25  ;;  %v3604_v25 = vld [vmem:[#allocation9 + $0x1b0] ss:$8 sps:$4 sm:$0xff]  }
 0x13c   :  { %2603 = vmatpush1.bf16.msra.mxu0 %v3532_v60  ;;  %v1761_v60 = vadd.f32 %v3843_v51, %v3841_v50  ;;  %v2129_v50 = vrot.slane %v3877_v44, %v3867_v38 }
 0x13d   :  { %2604 = vmatprep.subr.bf16.mxu0 %v3537_v39  ;;  %v3872_v39 = vsub.s32 0, %v3862_v42 }
 0x13e   :  { %2654 = vmatpush1.bf16.msra.mxu1 %v3580_v29 }
 0x13f   :  { %2655 = vmatprep.subr.bf16.mxu1 %v3585_v33  ;;  %v1765_v33 = vadd.f32 %v3851_v21, %v3849_v20 }
 0x140   :  { %2605 = vmatpush1.bf16.msra.mxu0 %v3535_v22 }
 0x141   :  { %2606 = vmatprep.subr.bf16.mxu0 %v3540_v59 }
 0x142   :  { %2656 = vmatpush1.bf16.msra.mxu1 %v3583_v40  ;;  %v1769_v40 = vadd.f32 %v3855_v24, %v3853_v23 }
 0x143   :  { %2657 = vmatprep.subr.bf16.mxu1 %v3588_v45 }
 0x144   :  { %2607 = vmatpush1.bf16.msra.mxu0 %v3538_v28 }
 0x145   :  { %2608 = vmatprep.subr.bf16.mxu0 %v3543_v30  ;;  %v2125_v30 = vrot.slane %v3877_v44, %v3872_v39 }
 0x146   :  { %2658 = vmatpush1.bf16.msra.mxu1 %v3586_v47 }
 0x147   :  { %2659 = vmatprep.subr.bf16.mxu1 %v3591_v49 }
 0x148   :  { %2609 = vmatpush1.bf16.msra.mxu0 %v3541_v36  ;;  %v3607_v36 = vld [vmem:[#allocation9 + $0x1a0] ss:$8 sps:$4 sm:$0xff]  }
 0x149   :  { %2610 = vmatprep.subr.bf16.mxu0 %v3546_v43 }
 0x14a   :  { %2660 = vmatpush1.bf16.msra.mxu1 %v3589_v56 }
 0x14b   :  { %2661 = vmatprep.subr.bf16.mxu1 %v3594_v58  ;;  %v3612_v58 = vld [vmem:[#allocation9 + $0x194] ss:$8 sps:$4 sm:$0xff]  }
 0x14c   :  { %2611 = vmatpush2.bf16.msra.mxu0 %v3544_v46 }
 0x14d   :  { %2612 = vmatprep.subr.bf16.mxu0 %v3549_v48  ;;  %v1771_v48 = vadd.f32 %v3859_v27, %v3857_v26 }
 0x14e   :  { %2662 = vmatpush2.bf16.msra.mxu1 %v3592_v62 }
 0x14f   :  { %2663 = vmatprep.subr.bf16.mxu1 %v3597_v1 }
 0x150   :  { %2613 = vmatpush2.bf16.msra.mxu0 %v3547_v55 }
 0x151   :  { %2614 = vmatprep.subr.bf16.mxu0 %v3552_v57 }
 0x152   :  { %2664 = vmatpush2.bf16.msra.mxu1 %v3595_v3 }
 0x153   :  { %2665 = vmatprep.subr.bf16.mxu1 %v3600_v5 }
 0x154   :  { %2615 = vmatpush2.bf16.msra.mxu0 %v3550_v61 }
 0x155   :  { %2616 = vmatprep.subr.bf16.mxu0 %v3555_v0  ;;  %v3610_v0 = vld [vmem:[#allocation9 + $0x190] ss:$8 sps:$4 sm:$0xff]  }
 0x156   :  { %2666 = vmatpush2.bf16.msra.mxu1 %v3598_v7  ;;  %v3615_v7 = vld [vmem:[#allocation9 + $0x184] ss:$8 sps:$4 sm:$0xff]  }
 0x157   :  { %2667 = vmatprep.subr.bf16.mxu1 %v3603_v9 }
 0x158   :  { %2617 = vmatpush2.bf16.msra.mxu0 %v3553_v2 }
 0x159   :  { %2618 = vmatprep.subr.bf16.mxu0 %v3558_v4 }
 0x15a   :  { %2668 = vmatpush2.bf16.msra.mxu1 %v3601_v11  ;;  %v3613_v11 = vld [vmem:[#allocation9 + $0x180] ss:$8 sps:$4 sm:$0xff]  }
 0x15b   :  { %2669 = vmatprep.subr.bf16.mxu1 %v3606_v15 }
 0x15c   :  { %2619 = vmatpush2.bf16.msra.mxu0 %v3556_v6 }
 0x15d   :  { %2620 = vmatprep.subr.bf16.mxu0 %v3561_v8 }
 0x15e   :  { %2670 = vmatpush2.bf16.msra.mxu1 %v3604_v25 }
 0x15f   :  { %2671 = vmatprep.subr.bf16.mxu1 %v3609_v19 }
 0x160   :  { %2621 = vmatpush2.bf16.msra.mxu0 %v3559_v10 }
 0x161   :  { %2622 = vmatprep.subr.bf16.mxu0 %v3564_v14 }
 0x162   :  { %2672 = vmatpush2.bf16.msra.mxu1 %v3607_v36 }
 0x163   :  { %2673 = vmatprep.subr.bf16.mxu1 %v3612_v58 }
 0x164   :  { %2623 = vmatpush2.bf16.msra.mxu0 %v3562_v12 }
 0x165   :  { %2624 = vmatprep.subr.bf16.mxu0 %v3567_v13 }
 0x166   :  { %2674 = vmatpush2.bf16.msra.mxu1 %v3610_v0 }
 0x167   :  { %2675 = vmatprep.subr.bf16.mxu1 %v3615_v7 }
 0x168   :  { %2625 = vmatpush2.bf16.msra.mxu0 %v3565_v41 }
 0x16a   :  { %v1809_v37 = vpop.f32.mrf.mxu0  ;;  %2676 = vmatpush2.bf16.msra.mxu1 %v3613_v11 }
 0x16b   :  { %v1860_v17 = vpop.f32.mrf.mxu1  ;;  %v1810_v63 = vadd.f32 %v1809_v37, %v1759_v54 }
 0x16c   :  { %v1811_v22 = vpop.f32.mrf.mxu0 }
 0x16d   :  { %v1862_v52 = vpop.f32.mrf.mxu1  ;;  %v1812_v59 = vadd.f32 %v1811_v22, %v1761_v60  ;;  %v1861_v29 = vadd.f32 %v1860_v17, %v1810_v63 }
 0x16e   :  { %v1813_v51 = vpop.f32.mrf.mxu0 }
 0x16f   :  { %v1864_v28 = vpop.f32.mrf.mxu1  ;;  %v1863_v31 = vadd.f32 %v1862_v52, %v1812_v59  ;;  %v1814_v32 = vadd.f32 %v1813_v51, %v1763_v16  ;;  %v2142_v49 = vadd.f32 %v2125_v30, %v1861_v29 }
 0x170   :  { %v1815_v34 = vpop.f32.mrf.mxu0 }
 0x171   :  { %v1866_v18 = vpop.f32.mrf.mxu1  ;;  %v1865_v35 = vadd.f32 %v1864_v28, %v1814_v32  ;;  %v2143_v43 = vadd.f32 %v2129_v50, %v1863_v31  ;;  %v1816_v45 = vadd.f32 %v1815_v34, %v1765_v33  ;;  %v2166_v4 = vmul.f32 0.2, %v2142_v49 }
 0x172   :  { %v1819_v46 = vpop.f32.mrf.mxu0  ;;  %vm2154_vm2 = vcmp.gt.f32.partialorder %v2142_v49, 0.0 }
 0x173   :  { %v1870_v47 = vpop.f32.mrf.mxu1  ;;  %v2146_v55 = vadd.f32 %v2125_v30, %v1865_v35  ;;  %v1867_v20 = vadd.f32 %v1866_v18, %v1816_v45  ;;  %v1820_v21 = vadd.f32 %v1819_v46, %v1769_v40  ;;  %v2167_v23 = vmul.f32 0.2, %v2143_v43 }
 0x174   :  { %v1821_v56 = vpop.f32.mrf.mxu0  ;;  %vm2155_vm1 = vcmp.gt.f32.partialorder %v2143_v43, 0.0  ;;  %v2178_v13 = vsel %vm2154_vm2, %v2142_v49, %v2166_v4  ;;  %v2132_v46 = vsub.s32 2, %v3862_v42  ;;  %v2136_v49 = vsub.s32 3, %v3862_v42 }
 0x175   :  { %v1872_v57 = vpop.f32.mrf.mxu1  ;;  %v2170_v61 = vmul.f32 0.2, %v2146_v55  ;;  %v1822_v62 = vadd.f32 %v1821_v56, %v1771_v48  ;;  %vm2158_vm0 = vcmp.gt.f32.partialorder %v2146_v55, 0.0  ;;  %v2147_v24 = vadd.f32 %v2129_v50, %v1867_v20 }
 0x176   :  { %v1871_v1 = vadd.f32 %v1870_v47, %v1820_v21  ;;  %v1823_v2 = vpop.f32.mrf.mxu0  ;;  %v2179_v14 = vsel %vm2155_vm1, %v2143_v43, %v2167_v23  ;;  %v2133_v20 = vrot.slane %v3877_v44, %v2132_v46  ;;  %vm2778_vm2 = vcmask 130112  }
 0x177   :  { %v1874_v3 = vpop.f32.mrf.mxu1  ;;  %v1873_v26 = vadd.f32 %v1872_v57, %v1822_v62  ;;  %vm2159_vm3 = vcmp.gt.f32.partialorder %v2147_v24, 0.0  ;;  %v2171_v27 = vmul.f32 0.2, %v2147_v24  ;;  %v2182_v8 = vsel %vm2158_vm0, %v2146_v55, %v2170_v61 }
 0x178   :  { %v1824_v5 = vpop.f32.mrf.mxu0  ;;  %v2150_v9 = vadd.f32 %v2125_v30, %v1871_v1  ;;  %v2190_v37 = vpack.c.bf16 %v2182_v8, %v2178_v13  ;;  %v2137_v61 = vrot.slane %v3877_v44, %v2136_v49 }
 0x179   :  { %v1875_v6 = vpop.f32.mrf.mxu1  ;;  %v2151_v10 = vadd.f32 %v2129_v50, %v1873_v26  ;;  %v2183_v12 = vsel %vm2159_vm3, %v2147_v24, %v2171_v27  ;;  %vm2785_vm3 = vcmask 195712  }
 0x17a   :  { %v2191_v54 = vpack.c.bf16 %v2183_v12, %v2179_v14  ;;  %v2174_v17 = vmul.f32 0.2, %v2150_v9  ;;  %vm2162_vm5 = vcmp.gt.f32.partialorder %v2150_v9, 0.0 }
 0x17b   :  { %v2175_v41 = vmul.f32 0.2, %v2151_v10  ;;  %vm2163_vm4 = vcmp.gt.f32.partialorder %v2151_v10, 0.0 }
 0x17c   :  { %2626 = vmatprep.mubr.bf16.mxu0 %v2191_v54  ;;  %v2186_v22 = vsel %vm2162_vm5, %v2150_v9, %v2174_v17 }
 0x17d   :  { %v2187_v60 = vsel %vm2163_vm4, %v2151_v10, %v2175_v41  ;;  %2627 = vmatmul.mubr.bf16.vlgmr.msra.gmra.mxu0 %v2190_v37  ;;  %v2194_v52 = vpack.c.bf16 %v2186_v22, %v2186_v22  ;;  %vm2788_vm4 = vcmask 188416  }
 0x17e   :  { %v2195_v63 = vpack.c.bf16 %v2187_v60, %v2187_v60 }
 0x180   :  { %2636 = vmatprep.mubr.bf16.mxu0 %v2195_v63 }
 0x185   :  { %2637 = vmatmul.mubr.bf16.gmra.mxu0 %v2194_v52 }
 0x1aa   :  { %v1911_v15 = vpop.f32.mrf.mxu0 }
 0x1ab   :  { %v1962_v16 = vpop.f32.mrf.mxu1 }
 0x1ac   :  { %v1963_v59 = vadd.f32 %v1962_v16, %v1911_v15  ;;  %v1913_v25 = vpop.f32.mrf.mxu0 }
 0x1ad   :  { %v1964_v50 = vpop.f32.mrf.mxu1 }
 0x1ae   :  { %v1965_v51 = vadd.f32 %v1964_v50, %v1913_v25  ;;  %v1915_v28 = vpop.f32.mrf.mxu0 }
 0x1af   :  { %v1966_v29 = vpop.f32.mrf.mxu1 }
 0x1b0   :  { %v1967_v30 = vadd.f32 %v1966_v29, %v1915_v28  ;;  %v1917_v31 = vpop.f32.mrf.mxu0 }
 0x1b1   :  { %v1968_v32 = vpop.f32.mrf.mxu1 }
 0x1b2   :  { %v1921_v33 = vpop.f32.mrf.mxu0  ;;  %v1969_v2 = vadd.f32 %v1968_v32, %v1917_v31 }
 0x1b3   :  { %v1972_v34 = vpop.f32.mrf.mxu1 }
 0x1b4   :  { %v1973_v18 = vadd.f32 %v1972_v34, %v1921_v33  ;;  %v1923_v19 = vpop.f32.mrf.mxu0 }
 0x1b5   :  { %v1974_v35 = vpop.f32.mrf.mxu1 }
 0x1b6   :  { %v1925_v36 = vpop.f32.mrf.mxu0  ;;  %v1975_v8 = vadd.f32 %v1974_v35, %v1923_v19 }
 0x1b7   :  { %v1976_v40 = vpop.f32.mrf.mxu1 }
 0x1b8   :  { %v1926_v43 = vpop.f32.mrf.mxu0 }
 0x1b9   :  { %v1977_v45 = vpop.f32.mrf.mxu1 }
 0x1ea   :  { %v2013_v47 = vpop.f32.mrf.mxu0 }
 0x1eb   :  { %v2064_v48 = vpop.f32.mrf.mxu1  ;;  %v2014_v55 = vadd.f32 %v2013_v47, %v1963_v59 }
 0x1ec   :  { %v2015_v21 = vpop.f32.mrf.mxu0 }
 0x1ed   :  { %v2066_v56 = vpop.f32.mrf.mxu1  ;;  %v2065_v57 = vadd.f32 %v2064_v48, %v2014_v55  ;;  %v2016_v58 = vadd.f32 %v2015_v21, %v1965_v51  ;;  %v2262_v55 = vld [vmem:[%s3920_s4] sm:$0x3] }
 0x1ee   :  { %v2017_v62 = vpop.f32.mrf.mxu0  ;;  %v2271_v21 = vrot.slane %v2262_v55, %v3867_v38 }
 0x1ef   :  { %v2068_v0 = vpop.f32.mrf.mxu1  ;;  %v2144_v23 = vadd.f32 %v2133_v20, %v2065_v57  ;;  %v2067_v24 = vadd.f32 %v2066_v56, %v2016_v58  ;;  %v2018_v1 = vadd.f32 %v2017_v62, %v1967_v30  ;;  %v2714_v62 = vld [vmem:[%s3921_s5] sm:$0x3] }
 0x1f0   :  { %v2019_v3 = vpop.f32.mrf.mxu0 }
 0x1f1   :  { %v2070_v4 = vpop.f32.mrf.mxu1  ;;  %v2069_v26 = vadd.f32 %v2068_v0, %v2018_v1  ;;  %v2145_v27 = vadd.f32 %v2137_v61, %v2067_v24  ;;  %v2020_v5 = vadd.f32 %v2019_v3, %v1969_v2  ;;  %v2168_v9 = vmul.f32 0.2, %v2144_v23 }
 0x1f2   :  { %v2023_v6 = vpop.f32.mrf.mxu0  ;;  %vm2156_vm6 = vcmp.gt.f32.partialorder %v2144_v23, 0.0 }
 0x1f3   :  { %v2074_v7 = vpop.f32.mrf.mxu1  ;;  %v2148_v10 = vadd.f32 %v2133_v20, %v2069_v26  ;;  %v2071_v11 = vadd.f32 %v2070_v4, %v2020_v5  ;;  %v2024_v14 = vadd.f32 %v2023_v6, %v1973_v18  ;;  %v2169_v54 = vmul.f32 0.2, %v2145_v27 }
 0x1f4   :  { %v2025_v44 = vpop.f32.mrf.mxu0  ;;  %v2180_v22 = vsel %vm2156_vm6, %v2144_v23, %v2168_v9  ;;  %vm2157_vm8 = vcmp.gt.f32.partialorder %v2145_v27, 0.0  ;;  %v2719_v4 = vrot.slane %v2714_v62, %v3872_v39  ;;  %v2723_v26 = vrot.slane %v2714_v62, %v3867_v38 }
 0x1f5   :  { %v2076_v12 = vpop.f32.mrf.mxu1  ;;  %vm2160_vm7 = vcmp.gt.f32.partialorder %v2148_v10, 0.0  ;;  %v2172_v13 = vmul.f32 0.2, %v2148_v10  ;;  %v2026_v41 = vadd.f32 %v2025_v44, %v1975_v8  ;;  %v2149_v37 = vadd.f32 %v2137_v61, %v2071_v11 }
 0x1f6   :  { %v2075_v17 = vadd.f32 %v2074_v7, %v2024_v14  ;;  %v2027_v60 = vpop.f32.mrf.mxu0  ;;  %v2181_v29 = vsel %vm2157_vm8, %v2145_v27, %v2169_v54 }
 0x1f7   :  { %v2078_v63 = vpop.f32.mrf.mxu1  ;;  %v2184_v52 = vsel %vm2160_vm7, %v2148_v10, %v2172_v13  ;;  %v2077_v15 = vadd.f32 %v2076_v12, %v2026_v41  ;;  %vm2161_vm9 = vcmp.gt.f32.partialorder %v2149_v37, 0.0  ;;  %v2173_v59 = vmul.f32 0.2, %v2149_v37 }
 0x1f8   :  { %v2192_v16 = vpack.c.bf16 %v2184_v52, %v2180_v22  ;;  %v2028_v25 = vpop.f32.mrf.mxu0  ;;  %v2152_v51 = vadd.f32 %v2133_v20, %v2075_v17  ;;  %v2267_v20 = vrot.slane %v2262_v55, %v3872_v39 }
 0x1f9   :  { %v2079_v50 = vpop.f32.mrf.mxu1  ;;  %v2153_v28 = vadd.f32 %v2137_v61, %v2077_v15  ;;  %v2185_v30 = vsel %vm2161_vm9, %v2149_v37, %v2173_v59 }
 0x1fa   :  { %v2193_v32 = vpack.c.bf16 %v2185_v30, %v2181_v29  ;;  %v2176_v33 = vmul.f32 0.2, %v2152_v51  ;;  %vm2164_vm11 = vcmp.gt.f32.partialorder %v2152_v51, 0.0 }
 0x1fb   :  { %v2177_v31 = vmul.f32 0.2, %v2153_v28  ;;  %vm2165_vm10 = vcmp.gt.f32.partialorder %v2153_v28, 0.0 }
 0x1fc   :  { %2677 = vmatprep.mubr.bf16.mxu1 %v2193_v32  ;;  %v2188_v19 = vsel %vm2164_vm11, %v2152_v51, %v2176_v33 }
 0x1fd   :  { %v2189_v34 = vsel %vm2165_vm10, %v2153_v28, %v2177_v31  ;;  %2678 = vmatmul.mubr.bf16.vlgmr.msra.gmra.mxu1 %v2192_v16  ;;  %v2196_v35 = vpack.c.bf16 %v2188_v19, %v2188_v19  ;;  %v2742_v31 = vstv %s3922_s6  ;;  %s3723_s6 = smov [#allocation10]  }
 0x1fe   :  { %v2197_v18 = vpack.c.bf16 %v2189_v34, %v2189_v34  ;;  %s2796_s24 = sshll.u32 %s3723_s6, 4  ;;  %s2797_s24 = int_to_ptr.vmem [resolvable:$true] %s2796_s24 }
 0x1ff   :  { %s3688_s25 = scalar_lea.vmem %s2797_s24, 16  ;;  %s3692_s26 = scalar_lea.vmem %s2797_s24, 32 }
 0x200   :  { %2687 = vmatprep.mubr.bf16.mxu1 %v2197_v18  ;;  %p3689_p1 = scmp.ne.s32.totalorder %s2797_s24, %s3688_s25  ;;  %p3693_p2 = scmp.lt.s32.totalorder %s2797_s24, %s2797_s24 }
 0x201   :  { %p3694_p3 = scmp.lt.s32.totalorder %s3692_s26, %s3688_s25 }
 0x203   :  { %p3695_p4 = por %p3694_p3, %p3693_p2 }
 0x205   :  { %2688 = vmatmul.mubr.bf16.gmra.mxu1 %v2196_v35  ;;  %p3696_p5 = pnand %p3695_p4, %p3689_p1 }
 0x23d   :  { %v2628_v36 = vpop.f32.mrf.mxu0 }
 0x23e   :  { %v2629_v56 = vadd.f32 %v2628_v36, %v2267_v20 }
 0x23f   :  { %v2630_v40 = vpop.f32.mrf.mxu0 }
 0x240   :  { %v2631_v58 = vadd.f32 %v2630_v40, %v2271_v21 }
 0x241   :  { %v2632_v43 = vpop.f32.mrf.mxu0 }
 0x242   :  { %v2633_v23 = vadd.f32 %v2632_v43, %v2267_v20 }
 0x243   :  { %v2634_v45 = vpop.f32.mrf.mxu0 }
 0x244   :  { %v2635_v2 = vadd.f32 %v2634_v45, %v2271_v21 }
 0x245   :  { %v2638_v46 = vpop.f32.mrf.mxu0 }
 0x246   :  { %v2639_v7 = vadd.f32 %v2638_v46, %v2267_v20 }
 0x247   :  { %v2640_v47 = vpop.f32.mrf.mxu0 }
 0x248   :  { %v2641_v14 = vadd.f32 %v2640_v47, %v2271_v21 }
 0x249   :  { %v2642_v48 = vpop.f32.mrf.mxu0 }
 0x24b   :  { %v2643_v49 = vpop.f32.mrf.mxu0 }
 0x2bd   :  { %v2679_v57 = vpop.f32.mrf.mxu1 }
 0x2be   :  { %v2680_v61 = vadd.f32 %v2679_v57, %v2629_v56  ;;  %v2768_v57 = vand.u32 127, %v2122_v53 }
 0x2bf   :  { %v2681_v0 = vpop.f32.mrf.mxu1 }
 0x2c0   :  { %vm2696_vm12 = vcmp.gt.f32.partialorder %v2680_v61, 0.0  ;;  %v2702_v24 = vmul.f32 0.2, %v2680_v61  ;;  %v2682_v1 = vadd.f32 %v2681_v0, %v2631_v58  ;;  %v2773_v58 = vadd.s32 4294967288, %v2768_v57 }
 0x2c1   :  { %v2683_v3 = vpop.f32.mrf.mxu1 }
 0x2c2   :  { %vm2697_vm13 = vcmp.gt.f32.partialorder %v2682_v1, 0.0  ;;  %v2703_v27 = vmul.f32 0.2, %v2682_v1  ;;  %v2684_v5 = vadd.f32 %v2683_v3, %v2633_v23  ;;  %v2708_v6 = vsel %vm2696_vm12, %v2680_v61, %v2702_v24 }
 0x2c3   :  { %v2685_v8 = vpop.f32.mrf.mxu1  ;;  %v2726_v12 = vmul.f32 %v2719_v4, %v2708_v6  ;;  %v2780_v61 = vadd.s32 4294967280, %v2768_v57  ;;  %v2776_v62 = vsub.s32 %v2773_v58, %v3862_v42  ;;  %v2771_v23 = vsub.s32 %v2768_v57, %v3862_v42 }
 0x2c4   :  { %vm2698_vm14 = vcmp.gt.f32.partialorder %v2684_v5, 0.0  ;;  %v2704_v9 = vmul.f32 0.2, %v2684_v5  ;;  %v2686_v10 = vadd.f32 %v2685_v8, %v2635_v2  ;;  %v2709_v11 = vsel %vm2697_vm13, %v2682_v1, %v2703_v27 }
 0x2c5   :  { %v2689_v44 = vpop.f32.mrf.mxu1  ;;  %v2727_v13 = vmul.f32 %v2723_v26, %v2709_v11  ;;  %v2783_v1 = vsub.s32 %v2780_v61, %v3862_v42 }
 0x2c6   :  { %vm2699_vm15 = vcmp.gt.f32.partialorder %v2686_v10, 0.0  ;;  %v2705_v41 = vmul.f32 0.2, %v2686_v10  ;;  %v2690_v54 = vadd.f32 %v2689_v44, %v2639_v7  ;;  %v2710_v39 = vsel %vm2698_vm14, %v2684_v5, %v2704_v9 }
 0x2c7   :  { %v2691_v37 = vpop.f32.mrf.mxu1  ;;  %v2732_v38 = vadd.f32 %v2727_v13, %v2726_v12  ;;  %v2728_v52 = vmul.f32 %v2719_v4, %v2710_v39 }
 0x2c8   :  { %vm2700_vm0 = vcmp.gt.f32.partialorder %v2690_v54, 0.0  ;;  %v2706_v17 = vmul.f32 0.2, %v2690_v54  ;;  %v2692_v60 = vadd.f32 %v2691_v37, %v2641_v14  ;;  %v2711_v63 = vsel %vm2699_vm15, %v2686_v10, %v2705_v41 }
 0x2c9   :  { %v2693_v22 = vpop.f32.mrf.mxu1  ;;  %2733 = vadd.xlane.f32.xlu0 %v2732_v38  ;;  %v2729_v15 = vmul.f32 %v2723_v26, %v2711_v63 }
 0x2ca   :  { %vm2701_vm1 = vcmp.gt.f32.partialorder %v2692_v60, 0.0  ;;  %v2707_v16 = vmul.f32 0.2, %v2692_v60  ;;  %v2712_v59 = vsel %vm2700_vm0, %v2690_v54, %v2706_v17 }
 0x2cb   :  { %v2694_v25 = vpop.f32.mrf.mxu1  ;;  %v2735_v50 = vadd.f32 %v2729_v15, %v2728_v52  ;;  %v2730_v28 = vmul.f32 %v2719_v4, %v2712_v59 }
 0x2cc   :  { %v2713_v51 = vsel %vm2701_vm1, %v2692_v60, %v2707_v16 }
 0x2cd   :  { %2736 = vadd.xlane.f32.xlu0 %v2735_v50  ;;  %v2731_v29 = vmul.f32 %v2723_v26, %v2713_v51 }
 0x2cf   :  { %v2738_v30 = vadd.f32 %v2731_v29, %v2730_v28 }
 0x2d1   :  { %2739 = vadd.xlane.f32.xlu1 %v2738_v30 }
 0x352   :  { %v2734_v32 = vpop.xlane.xlu0 %2733 }
 0x353   :  { %v2743_v33 = vadd.f32 %v2742_v31, %v2734_v32 }
 0x355   :  { %v2746_v34 = vsub.f32 0.0, %v2743_v33 }
 0x356   :  { %v2737_v18 = vpop.xlane.xlu0 %2736 }
 0x357   :  { %v2749_v19 = vmul.f32 1.442695, %v2746_v34  ;;  %v2744_v35 = vadd.f32 %v2742_v31, %v2737_v18 }
 0x359   :  { %v2747_v36 = vsub.f32 0.0, %v2744_v35  ;;  %3616 = vpow2.f32 %v2749_v19 }
 0x35a   :  { %v2740_v40 = vpop.xlane.xlu1 %2739 }
 0x35b   :  { %v2751_v43 = vmul.f32 1.442695, %v2747_v36  ;;  %v2745_v45 = vadd.f32 %v2742_v31, %v2740_v40 }
 0x35d   :  { %3618 = vpow2.f32 %v2751_v43  ;;  %v2748_v46 = vsub.f32 0.0, %v2745_v45 }
 0x35f   :  { %v2753_v47 = vmul.f32 1.442695, %v2748_v46 }
 0x361   :  { %3620 = vpow2.f32 %v2753_v47 }
 0x366   :  { %v3617_v48 = vpop.eup %3616 }
 0x367   :  { %v2755_v55 = vadd.f32 1.0, %v3617_v48 }
 0x36a   :  { %v3619_v49 = vpop.eup %3618 }
 0x36b   :  { %v2756_v20 = vadd.f32 1.0, %v3619_v49 }
 0x36d   :  { %3622 = vrcp.f32 %v2756_v20 }
 0x36e   :  { %v3621_v21 = vpop.eup %3620  ;;  %3624 = vrcp.f32 %v2755_v55 }
 0x36f   :  { %v2757_v56 = vadd.f32 1.0, %v3621_v21 }
 0x371   :  { %3626 = vrcp.f32 %v2757_v56 }
 0x37a   :  { %v3623_v0 = vpop.eup %3622 }
 0x37b   :  { %v3625_v24 = vpop.eup %3624  ;;  %v2777_v2 = vrot.slane %v3623_v0, %v2776_v62 }
 0x37c   :  { %v2772_v4 = vrot.slane %v3625_v24, %v2771_v23 }
 0x37e   :  { %v3627_v3 = vpop.eup %3626  ;;  %v2779_v53 = vsel %vm2778_vm2, %v2777_v2, %v2772_v4 }
 0x37f   :  { %v2784_v26 = vrot.slane %v3627_v3, %v2783_v1 }
 0x381   :  { %v2786_v27 = vsel %vm2785_vm3, %v2784_v26, %v2779_v53 }
 0x382   :  { %2789 = vst.msk [vmem:[#allocation10] sm:$0x1] %vm2788_vm4, %v2786_v27 }
 0x383   :  { %3699 = shalt.err (!%p3696_p5)
}
 0x384   :  { %2799 = dma.vmem_to_hbm [thread:$0]  %s2797_s24, 16, %s3923_s7, [#allocation6]  }
 0x385   :  { %3712 = dma.done.wait [#allocation6], 16  }
 0x386   :  { %3713 = vsyncadd [#allocation6], 4294967280 }
 0x387   :  { %2803 = vsyncpa [#allocation5], 1 }
 0x388   :  { %2804 = vsyncpa [#allocation8], 1 }
 0x389   :  { %2805 = vsyncpa [#allocation6], 1 }

</bundles_post_ra>
